<compile_context>
chip_gen: v6e
topology: v6e:2x2x1
jax: 0.10.0
libtpu: 0.0.40
codegen_flags: <defaults>
</compile_context>

<pallas_src>
import functools

import jax
import jax.numpy as jnp
from jax import lax
from jax.experimental import pallas as pl
from jax.experimental.pallas import tpu as pltpu

BN_EPS = 1e-5  # PyTorch BatchNorm2d default


def _vmem_limit_bytes(tile_m, cin, cout, in_itemsize):
    """Right-sized VMEM request: double-buffered streaming tiles + resident params."""
    x_tile = tile_m * cin * in_itemsize
    y_tile = tile_m * cout * 4          # output tile (f32 worst case)
    st_tile = 8 * cout * 4              # per-tile stats block
    resident = cin * cout * 2 + 2 * cin * 4 + cout * 4   # bf16 W + affine + bias
    need = 2 * (x_tile + y_tile + st_tile) + 2 * resident
    # 2x headroom for compiler scratch, clamped well below v7x's 64 MiB VMEM.
    return int(min(max(2 * need, 8 << 20), 48 << 20))


def _layer_call(x2d, w_bf16, *, affine=None, bias=None, emit_stats=True,
                out_dtype=jnp.bfloat16, m_total, tile_m):
    """One fused layer:  [scale/shift + ReLU of prev layer]  ->  x @ W  (+bias)  (+stats).

    x2d:    (M_pad, Cin) activations (padded to a multiple of tile_m).
    w_bf16: (Cin, Cout) bf16 weight.
    affine: optional (2, Cin) f32 = [scale; shift] of the previous BatchNorm.
    bias:   optional (1, Cout) f32 bias of the final conv.
    Returns (y,) or (y, partial_stats) where partial_stats is (grid*8, Cout)
    with row 0 = per-tile sum(y), row 1 = per-tile sum(y*y) (masked to M).
    """
    m_pad, cin = x2d.shape
    cout = w_bf16.shape[1]
    assert m_pad % tile_m == 0
    grid_m = m_pad // tile_m
    need_mask = (m_pad != m_total)
    fuse_bn = affine is not None
    add_bias = bias is not None

    def kernel(*refs):
        it = iter(refs)
        x_ref = next(it)
        a_ref = next(it) if fuse_bn else None
        w_ref = next(it)
        b_ref = next(it) if add_bias else None
        y_ref = next(it)
        st_ref = next(it) if emit_stats else None

        h = x_ref[...].astype(jnp.float32)
        if fuse_bn:
            aff = a_ref[...]                                   # (2, cin) f32
            h = jnp.maximum(h * aff[0:1, :] + aff[1:2, :], 0.0)  # BN affine + ReLU
        # bf16 MXU matmul with f32 accumulation.
        y = jnp.dot(h.astype(jnp.bfloat16), w_ref[...],
                    preferred_element_type=jnp.float32)
        if add_bias:
            y = y + b_ref[...]
        y_ref[...] = y.astype(y_ref.dtype)

        if emit_stats:
            if need_mask:
                row = (lax.broadcasted_iota(jnp.int32, (tile_m, 1), 0)
                       + pl.program_id(0) * tile_m)
                ym = jnp.where(row < m_total, y, 0.0)
            else:
                ym = y
            st_ref[...] = jnp.zeros((8, cout), jnp.float32)
            st_ref[0:1, :] = jnp.sum(ym, axis=0, keepdims=True)       # sum
            st_ref[1:2, :] = jnp.sum(ym * y, axis=0, keepdims=True)   # sum of squares

    in_specs = [pl.BlockSpec((tile_m, cin), lambda i: (i, 0))]
    args = [x2d]
    if fuse_bn:
        in_specs.append(pl.BlockSpec((2, cin), lambda i: (0, 0)))     # resident
        args.append(affine)
    in_specs.append(pl.BlockSpec((cin, cout), lambda i: (0, 0)))      # resident weight
    args.append(w_bf16)
    if add_bias:
        in_specs.append(pl.BlockSpec((1, cout), lambda i: (0, 0)))    # resident bias
        args.append(bias)

    out_shape = [jax.ShapeDtypeStruct((m_pad, cout), out_dtype)]
    out_specs = [pl.BlockSpec((tile_m, cout), lambda i: (i, 0))]
    if emit_stats:
        out_shape.append(jax.ShapeDtypeStruct((grid_m * 8, cout), jnp.float32))
        out_specs.append(pl.BlockSpec((8, cout), lambda i: (i, 0)))

    return pl.pallas_call(
        kernel,
        grid=(grid_m,),
        in_specs=in_specs,
        out_specs=tuple(out_specs),
        out_shape=tuple(out_shape),
        compiler_params=pltpu.CompilerParams(
            dimension_semantics=("parallel",),   # independent M tiles -> megacore on v7x
            vmem_limit_bytes=_vmem_limit_bytes(
                tile_m, cin, cout, jnp.dtype(x2d.dtype).itemsize),
        ),
    )(*args)


def _bn_affine(partial_stats, gamma, beta, m_total):
    """Fold training-mode BatchNorm into per-channel scale/shift (f32, tiny)."""
    cout = partial_stats.shape[-1]
    s = partial_stats.reshape(-1, 8, cout)[:, :2, :].sum(axis=0)    # (2, cout)
    mean = s[0] / m_total
    var = jnp.maximum(s[1] / m_total - mean * mean, 0.0)            # biased var
    scale = gamma * lax.rsqrt(var + BN_EPS)
    shift = beta - mean * scale
    return jnp.stack([scale, shift], axis=0).astype(jnp.float32)    # (2, cout)


@functools.partial(jax.jit, static_argnames=("tile_m",))
def generator_forward(x_nhwc, params, *, tile_m=512):
    """Generator forward pass on channels-last input (N, H, W, nz) -> (N, H, W, nc)."""
    N, H, W, C = x_nhwc.shape
    M = N * H * W
    x2d = x_nhwc.reshape(M, C)              # free: channels already minor

    grid_m = pl.cdiv(M, tile_m)
    m_pad = grid_m * tile_m
    if m_pad != M:
        x2d = jnp.pad(x2d, ((0, m_pad - M), (0, 0)))

    # Layer 1: 1x1 conv (no bias) + batch statistics of its output.
    y, st = _layer_call(x2d, params["w1"], emit_stats=True,
                        m_total=M, tile_m=tile_m)
    aff = _bn_affine(st, params["g1"], params["b1"], M)

    # Layers 2..4: fuse (BN affine + ReLU of previous output) + 1x1 conv + stats.
    for i in (2, 3, 4):
        y, st = _layer_call(y, params[f"w{i}"], affine=aff, emit_stats=True,
                            m_total=M, tile_m=tile_m)
        aff = _bn_affine(st, params[f"g{i}"], params[f"b{i}"], M)

    # Layer 5: fuse (BN affine + ReLU) + final 1x1 conv with bias (no BN/ReLU).
    (out,) = _layer_call(y, params["w5"], affine=aff, bias=params["bias5"],
                         emit_stats=False, out_dtype=x_nhwc.dtype,
                         m_total=M, tile_m=tile_m)
    return out[:M].reshape(N, H, W, -1)


def init_params(key, nz, ngf, nc):
    """Deterministic synthetic parameters (DCGAN-style N(0, 0.02) conv weights).

    Conv weights are stored transposed as (cin, cout) in bfloat16 (MXU input
    dtype); BN gamma/beta and the final conv bias stay float32.
    """
    dims = [nz, ngf * 8, ngf * 4, ngf * 2, ngf * 4, nc]
    keys = jax.random.split(key, 14)
    params = {}
    for i in range(5):
        cin, cout = dims[i], dims[i + 1]
        w = 0.02 * jax.random.normal(keys[i], (cin, cout), jnp.float32)
        params[f"w{i + 1}"] = w.astype(jnp.bfloat16)
    for i in range(4):
        c = dims[i + 1]
        params[f"g{i + 1}"] = 1.0 + 0.1 * jax.random.normal(keys[5 + i], (c,), jnp.float32)
        params[f"b{i + 1}"] = 0.1 * jax.random.normal(keys[9 + i], (c,), jnp.float32)
    params["bias5"] = 0.02 * jax.random.normal(keys[13], (1, nc), jnp.float32)
    return params


def generator_reference(x_nhwc, params):
    """Pure-JAX float32 reference (PyTorch module semantics, train-mode BN)."""
    N, H, W, C = x_nhwc.shape
    h = x_nhwc.reshape(-1, C).astype(jnp.float32)
    for i in range(1, 5):
        y = h @ params[f"w{i}"].astype(jnp.float32)
        mean = jnp.mean(y, axis=0)
        var = jnp.var(y, axis=0)                      # biased, as PyTorch normalizes
        y_hat = (y - mean) * lax.rsqrt(var + BN_EPS)
        h = jnp.maximum(y_hat * params[f"g{i}"] + params[f"b{i}"], 0.0)
    out = h @ params["w5"].astype(jnp.float32) + params["bias5"]
    return out.reshape(N, H, W, -1)


if __name__ == "__main__":
    # Small shapes consistent with the module (channel ratios 8:4:2:4).
    nz, ngf, nc = 32, 16, 128
    N, H, W = 2, 12, 12          # M = 288 -> exercises multi-tile grid + row masking

    key = jax.random.PRNGKey(0)
    k_x, k_p = jax.random.split(key)
    x = jax.random.normal(k_x, (N, H, W, nz), dtype=jnp.float32)   # channels-last
    params = init_params(k_p, nz, ngf, nc)

    out = generator_forward(x, params, tile_m=128)
    out = jax.block_until_ready(out)
    assert out.shape == (N, H, W, nc), out.shape
    assert bool(jnp.all(jnp.isfinite(out)))

    ref = generator_reference(x, params)
    err = float(jnp.max(jnp.abs(out.astype(jnp.float32) - ref)))
    scale = float(jnp.max(jnp.abs(ref))) + 1e-6
    assert err / scale < 0.1, (err, scale)
    print("KERNEL_OK")
</pallas_src>

<mosaic_0001>
module attributes {stable_mosaic.version = 11 : i64} {
  func.func @kernel(%arg0: i32, %arg1: memref<128x32xf32, #tpu.memory_space<vmem>>, %arg2: memref<32x128xbf16, #tpu.memory_space<vmem>>, %arg3: memref<128x128xbf16, #tpu.memory_space<vmem>>, %arg4: memref<8x128xf32, #tpu.memory_space<vmem>>) attributes {dimension_semantics = [#tpu.dimension_semantics<parallel>], iteration_bounds = array<i64: 3>, scalar_prefetch = 0 : i64, scratch_operands = 0 : i64, tpu.core_type = #tpu.core_type<tc>, window_params = [{transform_indices = @transform_0, window_bounds = array<i64: 128, 32>}, {pipeline_mode = #tpu.pipeline_mode<synchronous>, transform_indices = @transform_1, window_bounds = array<i64: 32, 128>}, {transform_indices = @transform_2, window_bounds = array<i64: 128, 128>}, {transform_indices = @transform_3, window_bounds = array<i64: 8, 128>}]} {
    %c0 = arith.constant 0 : index
    %c0_0 = arith.constant 0 : index
    %0 = vector.load %arg1[%c0, %c0_0] : memref<128x32xf32, #tpu.memory_space<vmem>>, vector<128x32xf32>
    %1 = arith.truncf %0 : vector<128x32xf32> to vector<128x32xbf16>
    %c0_1 = arith.constant 0 : index
    %c0_2 = arith.constant 0 : index
    %2 = vector.load %arg2[%c0_1, %c0_2] : memref<32x128xbf16, #tpu.memory_space<vmem>>, vector<32x128xbf16>
    %cst = arith.constant dense<0.000000e+00> : vector<128x128xf32>
    %3 = tpu.matmul %1, %2, %cst {dimension_numbers = #tpu.dot_dimension_numbers<[1], [0], [0], [1], [0, 0, 1, 1], [], []>} : vector<128x32xbf16>, vector<32x128xbf16>, vector<128x128xf32> -> vector<128x128xf32>
    %4 = arith.truncf %3 : vector<128x128xf32> to vector<128x128xbf16>
    %c0_3 = arith.constant 0 : index
    %c0_4 = arith.constant 0 : index
    %5 = vector.load %arg3[%c0_3, %c0_4] : memref<128x128xbf16, #tpu.memory_space<vmem>>, vector<128x128xbf16>
    tpu.vector_store %arg3[%c0_3, %c0_4], %4 {strides = array<i32>} : memref<128x128xbf16, #tpu.memory_space<vmem>>, vector<128x128xbf16>,
    %6 = tpu.iota {dimensions = array<i32: 0>} : vector<128x1xi32>
    %c128_i32 = arith.constant 128 : i32
    %7 = arith.muli %arg0, %c128_i32 : i32
    %8 = vector.broadcast %7 : i32 to vector<128x1xi32>
    %9 = arith.addi %6, %8 : vector<128x1xi32>
    %c288_i32 = arith.constant 288 : i32
    %10 = vector.broadcast %c288_i32 : i32 to vector<128x1xi32>
    %11 = arith.cmpi slt, %9, %10 : vector<128x1xi32>
    %cst_5 = arith.constant 0.000000e+00 : f32
    %12 = vector.shape_cast %11 : vector<128x1xi1> to vector<128x1xi1>
    %13 = vector.broadcast %12 : vector<128x1xi1> to vector<128x128xi1>
    %14 = vector.broadcast %cst_5 : f32 to vector<128x128xf32>
    %15 = arith.select %13, %3, %14 : vector<128x128xi1>, vector<128x128xf32>
    %cst_6 = arith.constant 0.000000e+00 : f32
    %16 = vector.broadcast %cst_6 : f32 to vector<8x128xf32>
    %c0_7 = arith.constant 0 : index
    %c0_8 = arith.constant 0 : index
    %17 = vector.load %arg4[%c0_7, %c0_8] : memref<8x128xf32, #tpu.memory_space<vmem>>, vector<8x128xf32>
    tpu.vector_store %arg4[%c0_7, %c0_8], %16 {strides = array<i32>} : memref<8x128xf32, #tpu.memory_space<vmem>>, vector<8x128xf32>,
    %cst_9 = arith.constant dense<0.000000e+00> : vector<128xf32>
    %18 = vector.multi_reduction <add>, %15, %cst_9 [0] : vector<128x128xf32> to vector<128xf32>
    %19 = vector.shape_cast %18 : vector<128xf32> to vector<1x128xf32>
    %c0_10 = arith.constant 0 : index
    %c0_11 = arith.constant 0 : index
    %20 = vector.load %arg4[%c0_10, %c0_11] : memref<8x128xf32, #tpu.memory_space<vmem>>, vector<1x128xf32>
    tpu.vector_store %arg4[%c0_10, %c0_11], %19 {strides = array<i32>} : memref<8x128xf32, #tpu.memory_space<vmem>>, vector<1x128xf32>,
    %21 = arith.mulf %15, %3 : vector<128x128xf32>
    %cst_12 = arith.constant dense<0.000000e+00> : vector<128xf32>
    %22 = vector.multi_reduction <add>, %21, %cst_12 [0] : vector<128x128xf32> to vector<128xf32>
    %23 = vector.shape_cast %22 : vector<128xf32> to vector<1x128xf32>
    %c1 = arith.constant 1 : index
    %c0_13 = arith.constant 0 : index
    %24 = vector.load %arg4[%c1, %c0_13] : memref<8x128xf32, #tpu.memory_space<vmem>>, vector<1x128xf32>
    tpu.vector_store %arg4[%c1, %c0_13], %23 {strides = array<i32>} : memref<8x128xf32, #tpu.memory_space<vmem>>, vector<1x128xf32>,
    return
  }
  func.func @transform_0(%arg0: i32) -> (i32, i32) {
    %c0_i32 = arith.constant 0 : i32
    %c0_i32_0 = arith.constant 0 : i32
    return %arg0, %c0_i32 : i32, i32
  }
  func.func @transform_1(%arg0: i32) -> (i32, i32) {
    %c0_i32 = arith.constant 0 : i32
    %c0_i32_0 = arith.constant 0 : i32
    %c0_i32_1 = arith.constant 0 : i32
    return %c0_i32, %c0_i32_0 : i32, i32
  }
  func.func @transform_2(%arg0: i32) -> (i32, i32) {
    %c0_i32 = arith.constant 0 : i32
    %c0_i32_0 = arith.constant 0 : i32
    return %arg0, %c0_i32 : i32, i32
  }
  func.func @transform_3(%arg0: i32) -> (i32, i32) {
    %c0_i32 = arith.constant 0 : i32
    %c0_i32_0 = arith.constant 0 : i32
    return %arg0, %c0_i32 : i32, i32
  }
}

module attributes {stable_mosaic.version = 11 : i64} {
  func.func @kernel(%arg0: i32, %arg1: memref<128x128xbf16, #tpu.memory_space<vmem>>, %arg2: memref<2x128xf32, #tpu.memory_space<vmem>>, %arg3: memref<128x64xbf16, #tpu.memory_space<vmem>>, %arg4: memref<128x64xbf16, #tpu.memory_space<vmem>>, %arg5: memref<8x64xf32, #tpu.memory_space<vmem>>) attributes {dimension_semantics = [#tpu.dimension_semantics<parallel>], iteration_bounds = array<i64: 3>, scalar_prefetch = 0 : i64, scratch_operands = 0 : i64, tpu.core_type = #tpu.core_type<tc>, window_params = [{transform_indices = @transform_0, window_bounds = array<i64: 128, 128>}, {pipeline_mode = #tpu.pipeline_mode<synchronous>, transform_indices = @transform_1, window_bounds = array<i64: 2, 128>}, {pipeline_mode = #tpu.pipeline_mode<synchronous>, transform_indices = @transform_2, window_bounds = array<i64: 128, 64>}, {transform_indices = @transform_3, window_bounds = array<i64: 128, 64>}, {transform_indices = @transform_4, window_bounds = array<i64: 8, 64>}]} {
    %c0 = arith.constant 0 : index
    %c0_0 = arith.constant 0 : index
    %0 = vector.load %arg1[%c0, %c0_0] : memref<128x128xbf16, #tpu.memory_space<vmem>>, vector<128x128xbf16>
    %1 = arith.extf %0 : vector<128x128xbf16> to vector<128x128xf32>
    %c0_1 = arith.constant 0 : index
    %c0_2 = arith.constant 0 : index
    %2 = vector.load %arg2[%c0_1, %c0_2] : memref<2x128xf32, #tpu.memory_space<vmem>>, vector<2x128xf32>
    %3 = vector.extract_strided_slice %2 {offsets = [0, 0], sizes = [1, 128], strides = [1, 1]} : vector<2x128xf32> to vector<1x128xf32>
    %4 = vector.broadcast %3 : vector<1x128xf32> to vector<128x128xf32>
    %5 = arith.mulf %1, %4 : vector<128x128xf32>
    %6 = vector.extract_strided_slice %2 {offsets = [1, 0], sizes = [1, 128], strides = [1, 1]} : vector<2x128xf32> to vector<1x128xf32>
    %7 = vector.broadcast %6 : vector<1x128xf32> to vector<128x128xf32>
    %8 = arith.addf %5, %7 : vector<128x128xf32>
    %cst = arith.constant 0.000000e+00 : f32
    %9 = vector.broadcast %cst : f32 to vector<128x128xf32>
    %10 = arith.maximumf %8, %9 : vector<128x128xf32>
    %11 = arith.truncf %10 : vector<128x128xf32> to vector<128x128xbf16>
    %c0_3 = arith.constant 0 : index
    %c0_4 = arith.constant 0 : index
    %12 = vector.load %arg3[%c0_3, %c0_4] : memref<128x64xbf16, #tpu.memory_space<vmem>>, vector<128x64xbf16>
    %cst_5 = arith.constant dense<0.000000e+00> : vector<128x64xf32>
    %13 = tpu.matmul %11, %12, %cst_5 {dimension_numbers = #tpu.dot_dimension_numbers<[1], [0], [0], [1], [0, 0, 1, 1], [], []>} : vector<128x128xbf16>, vector<128x64xbf16>, vector<128x64xf32> -> vector<128x64xf32>
    %14 = arith.truncf %13 : vector<128x64xf32> to vector<128x64xbf16>
    %c0_6 = arith.constant 0 : index
    %c0_7 = arith.constant 0 : index
    %15 = vector.load %arg4[%c0_6, %c0_7] : memref<128x64xbf16, #tpu.memory_space<vmem>>, vector<128x64xbf16>
    tpu.vector_store %arg4[%c0_6, %c0_7], %14 {strides = array<i32>} : memref<128x64xbf16, #tpu.memory_space<vmem>>, vector<128x64xbf16>,
    %16 = tpu.iota {dimensions = array<i32: 0>} : vector<128x1xi32>
    %c128_i32 = arith.constant 128 : i32
    %17 = arith.muli %arg0, %c128_i32 : i32
    %18 = vector.broadcast %17 : i32 to vector<128x1xi32>
    %19 = arith.addi %16, %18 : vector<128x1xi32>
    %c288_i32 = arith.constant 288 : i32
    %20 = vector.broadcast %c288_i32 : i32 to vector<128x1xi32>
    %21 = arith.cmpi slt, %19, %20 : vector<128x1xi32>
    %cst_8 = arith.constant 0.000000e+00 : f32
    %22 = vector.shape_cast %21 : vector<128x1xi1> to vector<128x1xi1>
    %23 = vector.broadcast %22 : vector<128x1xi1> to vector<128x64xi1>
    %24 = vector.broadcast %cst_8 : f32 to vector<128x64xf32>
    %25 = arith.select %23, %13, %24 : vector<128x64xi1>, vector<128x64xf32>
    %cst_9 = arith.constant 0.000000e+00 : f32
    %26 = vector.broadcast %cst_9 : f32 to vector<8x64xf32>
    %c0_10 = arith.constant 0 : index
    %c0_11 = arith.constant 0 : index
    %27 = vector.load %arg5[%c0_10, %c0_11] : memref<8x64xf32, #tpu.memory_space<vmem>>, vector<8x64xf32>
    tpu.vector_store %arg5[%c0_10, %c0_11], %26 {strides = array<i32>} : memref<8x64xf32, #tpu.memory_space<vmem>>, vector<8x64xf32>,
    %cst_12 = arith.constant dense<0.000000e+00> : vector<64xf32>
    %28 = vector.multi_reduction <add>, %25, %cst_12 [0] : vector<128x64xf32> to vector<64xf32>
    %29 = vector.shape_cast %28 : vector<64xf32> to vector<1x64xf32>
    %c0_13 = arith.constant 0 : index
    %c0_14 = arith.constant 0 : index
    %30 = vector.load %arg5[%c0_13, %c0_14] : memref<8x64xf32, #tpu.memory_space<vmem>>, vector<1x64xf32>
    tpu.vector_store %arg5[%c0_13, %c0_14], %29 {strides = array<i32>} : memref<8x64xf32, #tpu.memory_space<vmem>>, vector<1x64xf32>,
    %31 = arith.mulf %25, %13 : vector<128x64xf32>
    %cst_15 = arith.constant dense<0.000000e+00> : vector<64xf32>
    %32 = vector.multi_reduction <add>, %31, %cst_15 [0] : vector<128x64xf32> to vector<64xf32>
    %33 = vector.shape_cast %32 : vector<64xf32> to vector<1x64xf32>
    %c1 = arith.constant 1 : index
    %c0_16 = arith.constant 0 : index
    %34 = vector.load %arg5[%c1, %c0_16] : memref<8x64xf32, #tpu.memory_space<vmem>>, vector<1x64xf32>
    tpu.vector_store %arg5[%c1, %c0_16], %33 {strides = array<i32>} : memref<8x64xf32, #tpu.memory_space<vmem>>, vector<1x64xf32>,
    return
  }
  func.func @transform_0(%arg0: i32) -> (i32, i32) {
    %c0_i32 = arith.constant 0 : i32
    %c0_i32_0 = arith.constant 0 : i32
    return %arg0, %c0_i32 : i32, i32
  }
  func.func @transform_1(%arg0: i32) -> (i32, i32) {
    %c0_i32 = arith.constant 0 : i32
    %c0_i32_0 = arith.constant 0 : i32
    %c0_i32_1 = arith.constant 0 : i32
    return %c0_i32, %c0_i32_0 : i32, i32
  }
  func.func @transform_2(%arg0: i32) -> (i32, i32) {
    %c0_i32 = arith.constant 0 : i32
    %c0_i32_0 = arith.constant 0 : i32
    %c0_i32_1 = arith.constant 0 : i32
    return %c0_i32, %c0_i32_0 : i32, i32
  }
  func.func @transform_3(%arg0: i32) -> (i32, i32) {
    %c0_i32 = arith.constant 0 : i32
    %c0_i32_0 = arith.constant 0 : i32
    return %arg0, %c0_i32 : i32, i32
  }
  func.func @transform_4(%arg0: i32) -> (i32, i32) {
    %c0_i32 = arith.constant 0 : i32
    %c0_i32_0 = arith.constant 0 : i32
    return %arg0, %c0_i32 : i32, i32
  }
}

module attributes {stable_mosaic.version = 11 : i64} {
  func.func @kernel(%arg0: i32, %arg1: memref<128x64xbf16, #tpu.memory_space<vmem>>, %arg2: memref<2x64xf32, #tpu.memory_space<vmem>>, %arg3: memref<64x32xbf16, #tpu.memory_space<vmem>>, %arg4: memref<128x32xbf16, #tpu.memory_space<vmem>>, %arg5: memref<8x32xf32, #tpu.memory_space<vmem>>) attributes {dimension_semantics = [#tpu.dimension_semantics<parallel>], iteration_bounds = array<i64: 3>, scalar_prefetch = 0 : i64, scratch_operands = 0 : i64, tpu.core_type = #tpu.core_type<tc>, window_params = [{transform_indices = @transform_0, window_bounds = array<i64: 128, 64>}, {pipeline_mode = #tpu.pipeline_mode<synchronous>, transform_indices = @transform_1, window_bounds = array<i64: 2, 64>}, {pipeline_mode = #tpu.pipeline_mode<synchronous>, transform_indices = @transform_2, window_bounds = array<i64: 64, 32>}, {transform_indices = @transform_3, window_bounds = array<i64: 128, 32>}, {transform_indices = @transform_4, window_bounds = array<i64: 8, 32>}]} {
    %c0 = arith.constant 0 : index
    %c0_0 = arith.constant 0 : index
    %0 = vector.load %arg1[%c0, %c0_0] : memref<128x64xbf16, #tpu.memory_space<vmem>>, vector<128x64xbf16>
    %1 = arith.extf %0 : vector<128x64xbf16> to vector<128x64xf32>
    %c0_1 = arith.constant 0 : index
    %c0_2 = arith.constant 0 : index
    %2 = vector.load %arg2[%c0_1, %c0_2] : memref<2x64xf32, #tpu.memory_space<vmem>>, vector<2x64xf32>
    %3 = vector.extract_strided_slice %2 {offsets = [0, 0], sizes = [1, 64], strides = [1, 1]} : vector<2x64xf32> to vector<1x64xf32>
    %4 = vector.broadcast %3 : vector<1x64xf32> to vector<128x64xf32>
    %5 = arith.mulf %1, %4 : vector<128x64xf32>
    %6 = vector.extract_strided_slice %2 {offsets = [1, 0], sizes = [1, 64], strides = [1, 1]} : vector<2x64xf32> to vector<1x64xf32>
    %7 = vector.broadcast %6 : vector<1x64xf32> to vector<128x64xf32>
    %8 = arith.addf %5, %7 : vector<128x64xf32>
    %cst = arith.constant 0.000000e+00 : f32
    %9 = vector.broadcast %cst : f32 to vector<128x64xf32>
    %10 = arith.maximumf %8, %9 : vector<128x64xf32>
    %11 = arith.truncf %10 : vector<128x64xf32> to vector<128x64xbf16>
    %c0_3 = arith.constant 0 : index
    %c0_4 = arith.constant 0 : index
    %12 = vector.load %arg3[%c0_3, %c0_4] : memref<64x32xbf16, #tpu.memory_space<vmem>>, vector<64x32xbf16>
    %cst_5 = arith.constant dense<0.000000e+00> : vector<128x32xf32>
    %13 = tpu.matmul %11, %12, %cst_5 {dimension_numbers = #tpu.dot_dimension_numbers<[1], [0], [0], [1], [0, 0, 1, 1], [], []>} : vector<128x64xbf16>, vector<64x32xbf16>, vector<128x32xf32> -> vector<128x32xf32>
    %14 = arith.truncf %13 : vector<128x32xf32> to vector<128x32xbf16>
    %c0_6 = arith.constant 0 : index
    %c0_7 = arith.constant 0 : index
    %15 = vector.load %arg4[%c0_6, %c0_7] : memref<128x32xbf16, #tpu.memory_space<vmem>>, vector<128x32xbf16>
    tpu.vector_store %arg4[%c0_6, %c0_7], %14 {strides = array<i32>} : memref<128x32xbf16, #tpu.memory_space<vmem>>, vector<128x32xbf16>,
    %16 = tpu.iota {dimensions = array<i32: 0>} : vector<128x1xi32>
    %c128_i32 = arith.constant 128 : i32
    %17 = arith.muli %arg0, %c128_i32 : i32
    %18 = vector.broadcast %17 : i32 to vector<128x1xi32>
    %19 = arith.addi %16, %18 : vector<128x1xi32>
    %c288_i32 = arith.constant 288 : i32
    %20 = vector.broadcast %c288_i32 : i32 to vector<128x1xi32>
    %21 = arith.cmpi slt, %19, %20 : vector<128x1xi32>
    %cst_8 = arith.constant 0.000000e+00 : f32
    %22 = vector.shape_cast %21 : vector<128x1xi1> to vector<128x1xi1>
    %23 = vector.broadcast %22 : vector<128x1xi1> to vector<128x32xi1>
    %24 = vector.broadcast %cst_8 : f32 to vector<128x32xf32>
    %25 = arith.select %23, %13, %24 : vector<128x32xi1>, vector<128x32xf32>
    %cst_9 = arith.constant 0.000000e+00 : f32
    %26 = vector.broadcast %cst_9 : f32 to vector<8x32xf32>
    %c0_10 = arith.constant 0 : index
    %c0_11 = arith.constant 0 : index
    %27 = vector.load %arg5[%c0_10, %c0_11] : memref<8x32xf32, #tpu.memory_space<vmem>>, vector<8x32xf32>
    tpu.vector_store %arg5[%c0_10, %c0_11], %26 {strides = array<i32>} : memref<8x32xf32, #tpu.memory_space<vmem>>, vector<8x32xf32>,
    %cst_12 = arith.constant dense<0.000000e+00> : vector<32xf32>
    %28 = vector.multi_reduction <add>, %25, %cst_12 [0] : vector<128x32xf32> to vector<32xf32>
    %29 = vector.shape_cast %28 : vector<32xf32> to vector<1x32xf32>
    %c0_13 = arith.constant 0 : index
    %c0_14 = arith.constant 0 : index
    %30 = vector.load %arg5[%c0_13, %c0_14] : memref<8x32xf32, #tpu.memory_space<vmem>>, vector<1x32xf32>
    tpu.vector_store %arg5[%c0_13, %c0_14], %29 {strides = array<i32>} : memref<8x32xf32, #tpu.memory_space<vmem>>, vector<1x32xf32>,
    %31 = arith.mulf %25, %13 : vector<128x32xf32>
    %cst_15 = arith.constant dense<0.000000e+00> : vector<32xf32>
    %32 = vector.multi_reduction <add>, %31, %cst_15 [0] : vector<128x32xf32> to vector<32xf32>
    %33 = vector.shape_cast %32 : vector<32xf32> to vector<1x32xf32>
    %c1 = arith.constant 1 : index
    %c0_16 = arith.constant 0 : index
    %34 = vector.load %arg5[%c1, %c0_16] : memref<8x32xf32, #tpu.memory_space<vmem>>, vector<1x32xf32>
    tpu.vector_store %arg5[%c1, %c0_16], %33 {strides = array<i32>} : memref<8x32xf32, #tpu.memory_space<vmem>>, vector<1x32xf32>,
    return
  }
  func.func @transform_0(%arg0: i32) -> (i32, i32) {
    %c0_i32 = arith.constant 0 : i32
    %c0_i32_0 = arith.constant 0 : i32
    return %arg0, %c0_i32 : i32, i32
  }
  func.func @transform_1(%arg0: i32) -> (i32, i32) {
    %c0_i32 = arith.constant 0 : i32
    %c0_i32_0 = arith.constant 0 : i32
    %c0_i32_1 = arith.constant 0 : i32
    return %c0_i32, %c0_i32_0 : i32, i32
  }
  func.func @transform_2(%arg0: i32) -> (i32, i32) {
    %c0_i32 = arith.constant 0 : i32
    %c0_i32_0 = arith.constant 0 : i32
    %c0_i32_1 = arith.constant 0 : i32
    return %c0_i32, %c0_i32_0 : i32, i32
  }
  func.func @transform_3(%arg0: i32) -> (i32, i32) {
    %c0_i32 = arith.constant 0 : i32
    %c0_i32_0 = arith.constant 0 : i32
    return %arg0, %c0_i32 : i32, i32
  }
  func.func @transform_4(%arg0: i32) -> (i32, i32) {
    %c0_i32 = arith.constant 0 : i32
    %c0_i32_0 = arith.constant 0 : i32
    return %arg0, %c0_i32 : i32, i32
  }
}

module attributes {stable_mosaic.version = 11 : i64} {
  func.func @kernel(%arg0: i32, %arg1: memref<128x32xbf16, #tpu.memory_space<vmem>>, %arg2: memref<2x32xf32, #tpu.memory_space<vmem>>, %arg3: memref<32x64xbf16, #tpu.memory_space<vmem>>, %arg4: memref<128x64xbf16, #tpu.memory_space<vmem>>, %arg5: memref<8x64xf32, #tpu.memory_space<vmem>>) attributes {dimension_semantics = [#tpu.dimension_semantics<parallel>], iteration_bounds = array<i64: 3>, scalar_prefetch = 0 : i64, scratch_operands = 0 : i64, tpu.core_type = #tpu.core_type<tc>, window_params = [{transform_indices = @transform_0, window_bounds = array<i64: 128, 32>}, {pipeline_mode = #tpu.pipeline_mode<synchronous>, transform_indices = @transform_1, window_bounds = array<i64: 2, 32>}, {pipeline_mode = #tpu.pipeline_mode<synchronous>, transform_indices = @transform_2, window_bounds = array<i64: 32, 64>}, {transform_indices = @transform_3, window_bounds = array<i64: 128, 64>}, {transform_indices = @transform_4, window_bounds = array<i64: 8, 64>}]} {
    %c0 = arith.constant 0 : index
    %c0_0 = arith.constant 0 : index
    %0 = vector.load %arg1[%c0, %c0_0] : memref<128x32xbf16, #tpu.memory_space<vmem>>, vector<128x32xbf16>
    %1 = arith.extf %0 : vector<128x32xbf16> to vector<128x32xf32>
    %c0_1 = arith.constant 0 : index
    %c0_2 = arith.constant 0 : index
    %2 = vector.load %arg2[%c0_1, %c0_2] : memref<2x32xf32, #tpu.memory_space<vmem>>, vector<2x32xf32>
    %3 = vector.extract_strided_slice %2 {offsets = [0, 0], sizes = [1, 32], strides = [1, 1]} : vector<2x32xf32> to vector<1x32xf32>
    %4 = vector.broadcast %3 : vector<1x32xf32> to vector<128x32xf32>
    %5 = arith.mulf %1, %4 : vector<128x32xf32>
    %6 = vector.extract_strided_slice %2 {offsets = [1, 0], sizes = [1, 32], strides = [1, 1]} : vector<2x32xf32> to vector<1x32xf32>
    %7 = vector.broadcast %6 : vector<1x32xf32> to vector<128x32xf32>
    %8 = arith.addf %5, %7 : vector<128x32xf32>
    %cst = arith.constant 0.000000e+00 : f32
    %9 = vector.broadcast %cst : f32 to vector<128x32xf32>
    %10 = arith.maximumf %8, %9 : vector<128x32xf32>
    %11 = arith.truncf %10 : vector<128x32xf32> to vector<128x32xbf16>
    %c0_3 = arith.constant 0 : index
    %c0_4 = arith.constant 0 : index
    %12 = vector.load %arg3[%c0_3, %c0_4] : memref<32x64xbf16, #tpu.memory_space<vmem>>, vector<32x64xbf16>
    %cst_5 = arith.constant dense<0.000000e+00> : vector<128x64xf32>
    %13 = tpu.matmul %11, %12, %cst_5 {dimension_numbers = #tpu.dot_dimension_numbers<[1], [0], [0], [1], [0, 0, 1, 1], [], []>} : vector<128x32xbf16>, vector<32x64xbf16>, vector<128x64xf32> -> vector<128x64xf32>
    %14 = arith.truncf %13 : vector<128x64xf32> to vector<128x64xbf16>
    %c0_6 = arith.constant 0 : index
    %c0_7 = arith.constant 0 : index
    %15 = vector.load %arg4[%c0_6, %c0_7] : memref<128x64xbf16, #tpu.memory_space<vmem>>, vector<128x64xbf16>
    tpu.vector_store %arg4[%c0_6, %c0_7], %14 {strides = array<i32>} : memref<128x64xbf16, #tpu.memory_space<vmem>>, vector<128x64xbf16>,
    %16 = tpu.iota {dimensions = array<i32: 0>} : vector<128x1xi32>
    %c128_i32 = arith.constant 128 : i32
    %17 = arith.muli %arg0, %c128_i32 : i32
    %18 = vector.broadcast %17 : i32 to vector<128x1xi32>
    %19 = arith.addi %16, %18 : vector<128x1xi32>
    %c288_i32 = arith.constant 288 : i32
    %20 = vector.broadcast %c288_i32 : i32 to vector<128x1xi32>
    %21 = arith.cmpi slt, %19, %20 : vector<128x1xi32>
    %cst_8 = arith.constant 0.000000e+00 : f32
    %22 = vector.shape_cast %21 : vector<128x1xi1> to vector<128x1xi1>
    %23 = vector.broadcast %22 : vector<128x1xi1> to vector<128x64xi1>
    %24 = vector.broadcast %cst_8 : f32 to vector<128x64xf32>
    %25 = arith.select %23, %13, %24 : vector<128x64xi1>, vector<128x64xf32>
    %cst_9 = arith.constant 0.000000e+00 : f32
    %26 = vector.broadcast %cst_9 : f32 to vector<8x64xf32>
    %c0_10 = arith.constant 0 : index
    %c0_11 = arith.constant 0 : index
    %27 = vector.load %arg5[%c0_10, %c0_11] : memref<8x64xf32, #tpu.memory_space<vmem>>, vector<8x64xf32>
    tpu.vector_store %arg5[%c0_10, %c0_11], %26 {strides = array<i32>} : memref<8x64xf32, #tpu.memory_space<vmem>>, vector<8x64xf32>,
    %cst_12 = arith.constant dense<0.000000e+00> : vector<64xf32>
    %28 = vector.multi_reduction <add>, %25, %cst_12 [0] : vector<128x64xf32> to vector<64xf32>
    %29 = vector.shape_cast %28 : vector<64xf32> to vector<1x64xf32>
    %c0_13 = arith.constant 0 : index
    %c0_14 = arith.constant 0 : index
    %30 = vector.load %arg5[%c0_13, %c0_14] : memref<8x64xf32, #tpu.memory_space<vmem>>, vector<1x64xf32>
    tpu.vector_store %arg5[%c0_13, %c0_14], %29 {strides = array<i32>} : memref<8x64xf32, #tpu.memory_space<vmem>>, vector<1x64xf32>,
    %31 = arith.mulf %25, %13 : vector<128x64xf32>
    %cst_15 = arith.constant dense<0.000000e+00> : vector<64xf32>
    %32 = vector.multi_reduction <add>, %31, %cst_15 [0] : vector<128x64xf32> to vector<64xf32>
    %33 = vector.shape_cast %32 : vector<64xf32> to vector<1x64xf32>
    %c1 = arith.constant 1 : index
    %c0_16 = arith.constant 0 : index
    %34 = vector.load %arg5[%c1, %c0_16] : memref<8x64xf32, #tpu.memory_space<vmem>>, vector<1x64xf32>
    tpu.vector_store %arg5[%c1, %c0_16], %33 {strides = array<i32>} : memref<8x64xf32, #tpu.memory_space<vmem>>, vector<1x64xf32>,
    return
  }
  func.func @transform_0(%arg0: i32) -> (i32, i32) {
    %c0_i32 = arith.constant 0 : i32
    %c0_i32_0 = arith.constant 0 : i32
    return %arg0, %c0_i32 : i32, i32
  }
  func.func @transform_1(%arg0: i32) -> (i32, i32) {
    %c0_i32 = arith.constant 0 : i32
    %c0_i32_0 = arith.constant 0 : i32
    %c0_i32_1 = arith.constant 0 : i32
    return %c0_i32, %c0_i32_0 : i32, i32
  }
  func.func @transform_2(%arg0: i32) -> (i32, i32) {
    %c0_i32 = arith.constant 0 : i32
    %c0_i32_0 = arith.constant 0 : i32
    %c0_i32_1 = arith.constant 0 : i32
    return %c0_i32, %c0_i32_0 : i32, i32
  }
  func.func @transform_3(%arg0: i32) -> (i32, i32) {
    %c0_i32 = arith.constant 0 : i32
    %c0_i32_0 = arith.constant 0 : i32
    return %arg0, %c0_i32 : i32, i32
  }
  func.func @transform_4(%arg0: i32) -> (i32, i32) {
    %c0_i32 = arith.constant 0 : i32
    %c0_i32_0 = arith.constant 0 : i32
    return %arg0, %c0_i32 : i32, i32
  }
}

module attributes {stable_mosaic.version = 11 : i64} {
  func.func @kernel(%arg0: i32, %arg1: memref<128x64xbf16, #tpu.memory_space<vmem>>, %arg2: memref<2x64xf32, #tpu.memory_space<vmem>>, %arg3: memref<64x128xbf16, #tpu.memory_space<vmem>>, %arg4: memref<1x128xf32, #tpu.memory_space<vmem>>, %arg5: memref<128x128xf32, #tpu.memory_space<vmem>>) attributes {dimension_semantics = [#tpu.dimension_semantics<parallel>], iteration_bounds = array<i64: 3>, scalar_prefetch = 0 : i64, scratch_operands = 0 : i64, tpu.core_type = #tpu.core_type<tc>, window_params = [{transform_indices = @transform_0, window_bounds = array<i64: 128, 64>}, {pipeline_mode = #tpu.pipeline_mode<synchronous>, transform_indices = @transform_1, window_bounds = array<i64: 2, 64>}, {pipeline_mode = #tpu.pipeline_mode<synchronous>, transform_indices = @transform_2, window_bounds = array<i64: 64, 128>}, {pipeline_mode = #tpu.pipeline_mode<synchronous>, transform_indices = @transform_3, window_bounds = array<i64: 1, 128>}, {transform_indices = @transform_4, window_bounds = array<i64: 128, 128>}]} {
    %c0 = arith.constant 0 : index
    %c0_0 = arith.constant 0 : index
    %0 = vector.load %arg1[%c0, %c0_0] : memref<128x64xbf16, #tpu.memory_space<vmem>>, vector<128x64xbf16>
    %1 = arith.extf %0 : vector<128x64xbf16> to vector<128x64xf32>
    %c0_1 = arith.constant 0 : index
    %c0_2 = arith.constant 0 : index
    %2 = vector.load %arg2[%c0_1, %c0_2] : memref<2x64xf32, #tpu.memory_space<vmem>>, vector<2x64xf32>
    %3 = vector.extract_strided_slice %2 {offsets = [0, 0], sizes = [1, 64], strides = [1, 1]} : vector<2x64xf32> to vector<1x64xf32>
    %4 = vector.broadcast %3 : vector<1x64xf32> to vector<128x64xf32>
    %5 = arith.mulf %1, %4 : vector<128x64xf32>
    %6 = vector.extract_strided_slice %2 {offsets = [1, 0], sizes = [1, 64], strides = [1, 1]} : vector<2x64xf32> to vector<1x64xf32>
    %7 = vector.broadcast %6 : vector<1x64xf32> to vector<128x64xf32>
    %8 = arith.addf %5, %7 : vector<128x64xf32>
    %cst = arith.constant 0.000000e+00 : f32
    %9 = vector.broadcast %cst : f32 to vector<128x64xf32>
    %10 = arith.maximumf %8, %9 : vector<128x64xf32>
    %11 = arith.truncf %10 : vector<128x64xf32> to vector<128x64xbf16>
    %c0_3 = arith.constant 0 : index
    %c0_4 = arith.constant 0 : index
    %12 = vector.load %arg3[%c0_3, %c0_4] : memref<64x128xbf16, #tpu.memory_space<vmem>>, vector<64x128xbf16>
    %cst_5 = arith.constant dense<0.000000e+00> : vector<128x128xf32>
    %13 = tpu.matmul %11, %12, %cst_5 {dimension_numbers = #tpu.dot_dimension_numbers<[1], [0], [0], [1], [0, 0, 1, 1], [], []>} : vector<128x64xbf16>, vector<64x128xbf16>, vector<128x128xf32> -> vector<128x128xf32>
    %c0_6 = arith.constant 0 : index
    %c0_7 = arith.constant 0 : index
    %14 = vector.load %arg4[%c0_6, %c0_7] : memref<1x128xf32, #tpu.memory_space<vmem>>, vector<1x128xf32>
    %15 = vector.broadcast %14 : vector<1x128xf32> to vector<128x128xf32>
    %16 = arith.addf %13, %15 : vector<128x128xf32>
    %c0_8 = arith.constant 0 : index
    %c0_9 = arith.constant 0 : index
    %17 = vector.load %arg5[%c0_8, %c0_9] : memref<128x128xf32, #tpu.memory_space<vmem>>, vector<128x128xf32>
    tpu.vector_store %arg5[%c0_8, %c0_9], %16 {strides = array<i32>} : memref<128x128xf32, #tpu.memory_space<vmem>>, vector<128x128xf32>,
    return
  }
  func.func @transform_0(%arg0: i32) -> (i32, i32) {
    %c0_i32 = arith.constant 0 : i32
    %c0_i32_0 = arith.constant 0 : i32
    return %arg0, %c0_i32 : i32, i32
  }
  func.func @transform_1(%arg0: i32) -> (i32, i32) {
    %c0_i32 = arith.constant 0 : i32
    %c0_i32_0 = arith.constant 0 : i32
    %c0_i32_1 = arith.constant 0 : i32
    return %c0_i32, %c0_i32_0 : i32, i32
  }
  func.func @transform_2(%arg0: i32) -> (i32, i32) {
    %c0_i32 = arith.constant 0 : i32
    %c0_i32_0 = arith.constant 0 : i32
    %c0_i32_1 = arith.constant 0 : i32
    return %c0_i32, %c0_i32_0 : i32, i32
  }
  func.func @transform_3(%arg0: i32) -> (i32, i32) {
    %c0_i32 = arith.constant 0 : i32
    %c0_i32_0 = arith.constant 0 : i32
    %c0_i32_1 = arith.constant 0 : i32
    return %c0_i32, %c0_i32_0 : i32, i32
  }
  func.func @transform_4(%arg0: i32) -> (i32, i32) {
    %c0_i32 = arith.constant 0 : i32
    %c0_i32_0 = arith.constant 0 : i32
    return %arg0, %c0_i32 : i32, i32
  }
}

</mosaic_0001>

<bundles_post_ra>
// kernel: generator_forward.5
= control target key start
LH: loop header
LB: loop body
LE: loop exit
PB: predicated region body
PF: predicated region fallthrough
CT: control target
= control target key end

     0   :  { %s851_s12 = smov 0   ;;  %s997_s0 = inlined_call_operand.vmem [shape: f32[384,32], index: 0, kind: input, shape index: {}]   ;;  %s998_s1 = inlined_call_operand.vmem [shape: bf16[32,128], index: 1, kind: input, shape index: {}]   ;;  %s999_s2 = inlined_call_operand.vmem [shape: bf16[384,128], index: 2, kind: output, shape index: {0}]   ;;  %s1000_s3 = inlined_call_operand.vmem [shape: f32[24,128], index: 3, kind: output, shape index: {1}]  }
   0x1 LB: > { %s857_s13 = sadd.s32 4294967295, %s828_s12   ;;  %p679_p0 = scmp.ge.s32.totalorder %s828_s12, 1  ;;  %s828_s12 = sphi %s851_s12, %s14_s12  }
   0x2   : > { %p141_p1 = scmp.lt.s32.totalorder %s828_s12, 4 }
   0x4   : > { %p142_p2 = pnand %p679_p0, %p141_p1 }
   0x5   : > { %s680_s16 = sshll.u32 (!%p142_p2), %s857_s13, 4  ;;  %p181_p4 = scmp.lt.s32.totalorder (!%p142_p2), %s857_s13, 2 }
   0x6   : > { %145 = sbr.rel (%p142_p2) target bundleno = 265 (0x109), region = 28  ;;  %p170_p3 = scmp.lt.s32.totalorder (!%p142_p2), %s680_s16, 47 }
   0x7   : > { %s711_s28 = sshll.u32 (!%p142_p2), %s857_s13, 7 }
   0xb   : > { %v820_v0 = vld [vmem:[%s998_s1 + $0x8] sm:$0xff]   ;;  %v821_v1 = vld [vmem:[%s998_s1] sm:$0xff]   ;;  %s1002_s16 = smov (!%p170_p3, %s680_s16), 47  ;;  %vm226_vm0 = vcmask 261120   ;;  %v830_v26 = vmov 0.0   ;;  %v428_v27 = vlaneseq  ;;  %v913_v31 = vstv %s711_s28 }
   0xc   : > { %787 = vmatprep.subr.bf16.mxu0 %v820_v0  ;;  %807 = vmatprep.subr.bf16.mxu1 %v820_v0  ;;  %s681_s19 = sshll.u32 %s1002_s16, 3  ;;  %s683_s29 = sshll.u32 %s1002_s16, 2 }
   0xd   : > { %788 = vmatpush3.bf16.msra.mxu0 %v820_v0  ;;  %809 = vmatpush3.bf16.msra.mxu1 %v820_v0  ;;  %s874_s22 = scalar_lea.vmem %s997_s0, %s681_s19  ;;  %v908_v28 = vshrl.u32 %v428_v27, 7  ;;  %s932_s5 = scalar_lea.vmem %s999_s2, %s683_s29 }
   0xe   : > { %789 = vmatprep.subr.bf16.mxu0 %v821_v1  ;;  %808 = vmatprep.subr.bf16.mxu1 %v821_v1  ;;  %v186_v2 = vld [vmem:[%s874_s22] sm:$0xff]  ;;  %v187_v3 = vld [vmem:[%s874_s22 + $0x8] sm:$0xff]  ;;  %v188_v4 = vld [vmem:[%s874_s22 + $0x10] sm:$0xff]  ;;  %s182_s23 = scalar_select %p181_p4, %s857_s13, 2 }
   0xf   : > { %v202_v5 = vpack.c.bf16 %v187_v3, %v186_v2  ;;  %v189_v6 = vld [vmem:[%s874_s22 + $0x18] sm:$0xff]  ;;  %v190_v7 = vld [vmem:[%s874_s22 + $0x20] sm:$0xff]  ;;  %v191_v8 = vld [vmem:[%s874_s22 + $0x28] sm:$0xff]  ;;  %v431_v29 = vadd.s32 16, %v908_v28  ;;  %v430_v30 = vadd.s32 8, %v908_v28  ;;  %v432_v32 = vadd.s32 24, %v908_v28 }
  0x10   : > { %v203_v9 = vpack.c.bf16 %v189_v6, %v188_v4  ;;  %v204_v10 = vpack.c.bf16 %v191_v8, %v190_v7  ;;  %v194_v11 = vld [vmem:[%s874_s22 + $0x40] sm:$0xff]  ;;  %v195_v12 = vld [vmem:[%s874_s22 + $0x48] sm:$0xff]  ;;  %v196_v13 = vld [vmem:[%s874_s22 + $0x50] sm:$0xff]  ;;  %s684_s24 = sshll.u32 %s182_s23, 3  ;;  %v447_v33 = vadd.s32 %v913_v31, %v908_v28  ;;  %v433_v34 = vadd.s32 32, %v908_v28 }
  0x11   : > { %790 = vmatpush3.bf16.msra.mxu0 %v821_v1  ;;  %810 = vmatpush3.bf16.msra.mxu1 %v821_v1  ;;  %v197_v14 = vld [vmem:[%s874_s22 + $0x58] sm:$0xff]  ;;  %v206_v15 = vpack.c.bf16 %v195_v12, %v194_v11  ;;  %v198_v17 = vld [vmem:[%s874_s22 + $0x60] sm:$0xff]  ;;  %v199_v18 = vld [vmem:[%s874_s22 + $0x68] sm:$0xff]  ;;  %s905_s27 = scalar_lea.vmem %s1000_s3, %s684_s24  ;;  %v449_v36 = vadd.s32 %v913_v31, %v431_v29  ;;  %v448_v37 = vadd.s32 %v913_v31, %v430_v30  ;;  %v435_v40 = vadd.s32 48, %v908_v28 }
  0x12   : > { %791 = vmatprep.mubr.msk.bf16.mxu0 %vm226_vm0, %v202_v5  ;;  %v207_v16 = vpack.c.bf16 %v197_v14, %v196_v13  ;;  %v192_v19 = vld [vmem:[%s874_s22 + $0x30] sm:$0xff]  ;;  %v193_v20 = vld [vmem:[%s874_s22 + $0x38] sm:$0xff]  ;;  %v208_v21 = vpack.c.bf16 %v199_v18, %v198_v17  ;;  %527 = vst [vmem:[%s905_s27] sm:$0xff] %v830_v26  ;;  %v450_v38 = vadd.s32 %v913_v31, %v432_v32  ;;  %vm463_vm1 = vcmp.lt.s32.totalorder %v447_v33, 288 }
  0x13   : > { %799 = vmatprep.mubr.msk.bf16.mxu1 %vm226_vm0, %v206_v15  ;;  %v205_v22 = vpack.c.bf16 %v193_v20, %v192_v19  ;;  %v200_v23 = vld [vmem:[%s874_s22 + $0x70] sm:$0xff]  ;;  %v201_v24 = vld [vmem:[%s874_s22 + $0x78] sm:$0xff]  ;;  %v451_v41 = vadd.s32 %v913_v31, %v433_v34  ;;  %v436_v42 = vadd.s32 56, %v908_v28  ;;  %v434_v44 = vadd.s32 40, %v908_v28 }
  0x14   : > { %792 = vmatmul.mubr.msk.bf16.vlgmr.msra.gmra.mxu0 %vm226_vm0, %v203_v9  ;;  %800 = vmatmul.mubr.msk.bf16.vlgmr.msra.gmra.mxu1 %vm226_vm0, %v207_v16  ;;  %v209_v25 = vpack.c.bf16 %v201_v24, %v200_v23  ;;  %vm465_vm2 = vcmp.lt.s32.totalorder %v449_v36, 288  ;;  %vm464_vm3 = vcmp.lt.s32.totalorder %v448_v37, 288  ;;  %vm466_vm4 = vcmp.lt.s32.totalorder %v450_v38, 288 }
  0x15   : > { %795 = vmatprep.mubr.msk.bf16.mxu0 %vm226_vm0, %v204_v10  ;;  %803 = vmatprep.mubr.msk.bf16.mxu1 %vm226_vm0, %v208_v21  ;;  %v453_v50 = vadd.s32 %v913_v31, %v435_v40  ;;  %vm467_vm5 = vcmp.lt.s32.totalorder %v451_v41, 288  ;;  %v437_v51 = vadd.s32 64, %v908_v28  ;;  %v454_v52 = vadd.s32 %v913_v31, %v436_v42 }
  0x16   : > { %v452_v57 = vadd.s32 %v913_v31, %v434_v44  ;;  %v439_v0 = vadd.s32 80, %v908_v28  ;;  %v440_v1 = vadd.s32 88, %v908_v28  ;;  %v438_v3 = vadd.s32 72, %v908_v28 }
  0x17   : > { %vm469_vm6 = vcmp.lt.s32.totalorder %v453_v50, 288  ;;  %v455_v10 = vadd.s32 %v913_v31, %v437_v51  ;;  %vm470_vm8 = vcmp.lt.s32.totalorder %v454_v52, 288  ;;  %v441_v34 = vadd.s32 96, %v908_v28 }
  0x18   : > { %vm468_vm7 = vcmp.lt.s32.totalorder %v452_v57, 288  ;;  %v457_v16 = vadd.s32 %v913_v31, %v439_v0  ;;  %v456_v18 = vadd.s32 %v913_v31, %v438_v3  ;;  %v458_v23 = vadd.s32 %v913_v31, %v440_v1 }
  0x19   : > { %vm471_vm9 = vcmp.lt.s32.totalorder %v455_v10, 288  ;;  %v442_v38 = vadd.s32 104, %v908_v28  ;;  %v459_v50 = vadd.s32 %v913_v31, %v441_v34  ;;  %v444_v52 = vadd.s32 120, %v908_v28 }
  0x1a   : > { %vm472_vm10 = vcmp.lt.s32.totalorder %v456_v18, 288  ;;  %vm473_vm11 = vcmp.lt.s32.totalorder %v457_v16, 288  ;;  %vm474_vm12 = vcmp.lt.s32.totalorder %v458_v23, 288 }
  0x1b   : > { %v460_v57 = vadd.s32 %v913_v31, %v442_v38  ;;  %vm475_vm13 = vcmp.lt.s32.totalorder %v459_v50, 288 }
  0x1c   : > { %796 = vmatmul.mubr.msk.bf16.gmra.mxu0 %vm226_vm0, %v205_v22  ;;  %804 = vmatmul.mubr.msk.bf16.gmra.mxu1 %vm226_vm0, %v209_v25 }
  0x1d   : > { %vm476_vm14 = vcmp.lt.s32.totalorder %v460_v57, 288 }
  0xd4   : > { %v793_v35 = vpop.f32.mrf.mxu0  ;;  %v926_v43 = vpop.f32.mrf.mxu1 }
  0xd5   : > { %v513_v53 = vsel %vm465_vm2, %v793_v35, 0.0 }
  0xd6   : > { %v285_v39 = vpop.f32.mrf.mxu0  ;;  %v934_v48 = vpop.f32.mrf.mxu1  ;;  %v552_v4 = vmul.f32 %v793_v35, %v513_v53 }
  0xd7   : > { %v511_v46 = vsel %vm463_vm1, %v285_v39, 0.0  ;;  %v519_v44 = vsel %vm471_vm9, %v934_v48, 0.0 }
  0xd8   : > { %v794_v45 = vpop.f32.mrf.mxu0  ;;  %v940_v56 = vpop.f32.mrf.mxu1  ;;  %v550_v58 = vmul.f32 %v511_v46, %v285_v39 }
  0xd9   : > { %v738_v47 = vpack.c.bf16 %v794_v45, %v793_v35  ;;  %v758_v62 = vpack.c.bf16 %v940_v56, %v926_v43  ;;  %v514_v63 = vsel %vm466_vm4, %v794_v45, 0.0 }
  0xda   : > { %v288_v49 = vpop.f32.mrf.mxu0  ;;  %v949_v2 = vpop.f32.mrf.mxu1  ;;  %v553_v12 = vmul.f32 %v794_v45, %v514_v63  ;;  %v443_v45 = vadd.s32 112, %v908_v28  ;;  %v462_v28 = vadd.s32 %v913_v31, %v444_v52 }
  0xdb   : > { %770 = vst [vmem:[%s932_s5 + $0x8] sm:$0xff] %v738_v47   ;;  %v733_v54 = vpack.c.bf16 %v288_v49, %v285_v39  ;;  %v512_v55 = vsel %vm464_vm3, %v288_v49, 0.0  ;;  %774 = vst [vmem:[%s932_s5 + $0x28] sm:$0xff] %v758_v62   ;;  %v753_v8 = vpack.c.bf16 %v949_v2, %v934_v48  ;;  %v520_v51 = vsel %vm472_vm10, %v949_v2, 0.0 }
  0xdc   : > { %v528_v59 = vadd.f32 %v512_v55, %v511_v46  ;;  %v551_v60 = vmul.f32 %v512_v55, %v288_v49  ;;  %v797_v61 = vpop.f32.mrf.mxu0  ;;  %v957_v11 = vpop.f32.mrf.mxu1  ;;  %vm478_vm0 = vcmp.lt.s32.totalorder %v462_v28, 288 }
  0xdd   : > { %734 = vst [vmem:[%s932_s5] sm:$0xff] %v733_v54   ;;  %773 = vst [vmem:[%s932_s5 + $0x20] sm:$0xff] %v753_v8   ;;  %v517_v25 = vsel %vm469_vm6, %v797_v61, 0.0 }
  0xde   : > { %v529_v5 = vadd.f32 %v528_v59, %v513_v53  ;;  %v566_v6 = vadd.f32 %v551_v60, %v550_v58  ;;  %v301_v7 = vpop.f32.mrf.mxu0  ;;  %v333_v19 = vpop.f32.mrf.mxu1  ;;  %v556_v39 = vmul.f32 %v797_v61, %v517_v25  ;;  %v558_v53 = vmul.f32 %v519_v44, %v934_v48 }
  0xdf   : > { %v515_v9 = vsel %vm467_vm5, %v301_v7, 0.0  ;;  %v521_v58 = vsel %vm473_vm11, %v926_v43, 0.0  ;;  %v461_v59 = vadd.s32 %v913_v31, %v443_v45  ;;  %v523_v3 = vsel %vm475_vm13, %v333_v19, 0.0 }
  0xe0   : > { %v567_v13 = vadd.f32 %v566_v6, %v552_v4  ;;  %v530_v14 = vadd.f32 %v529_v5, %v514_v63  ;;  %v798_v15 = vpop.f32.mrf.mxu0  ;;  %v554_v21 = vmul.f32 %v515_v9, %v301_v7  ;;  %v806_v29 = vpop.f32.mrf.mxu1  ;;  %v522_v63 = vsel %vm474_vm12, %v940_v56, 0.0 }
  0xe1   : > { %v748_v17 = vpack.c.bf16 %v798_v15, %v797_v61  ;;  %v518_v35 = vsel %vm470_vm8, %v798_v15, 0.0  ;;  %v768_v36 = vpack.c.bf16 %v806_v29, %v957_v11  ;;  %v559_v61 = vmul.f32 %v520_v51, %v949_v2 }
  0xe2   : > { %v531_v20 = vadd.f32 %v530_v14, %v515_v9  ;;  %v568_v22 = vadd.f32 %v567_v13, %v553_v12  ;;  %v304_v24 = vpop.f32.mrf.mxu0  ;;  %v336_v37 = vpop.f32.mrf.mxu1  ;;  %v557_v46 = vmul.f32 %v798_v15, %v518_v35  ;;  %v560_v48 = vmul.f32 %v926_v43, %v521_v58 }
  0xe3   : > { %772 = vst [vmem:[%s932_s5 + $0x18] sm:$0xff] %v748_v17   ;;  %v743_v26 = vpack.c.bf16 %v304_v24, %v301_v7  ;;  %v516_v27 = vsel %vm468_vm7, %v304_v24, 0.0  ;;  %v763_v42 = vpack.c.bf16 %v336_v37, %v333_v19  ;;  %776 = vst [vmem:[%s932_s5 + $0x38] sm:$0xff] %v768_v36   ;;  %v561_v4 = vmul.f32 %v940_v56, %v522_v63 }
  0xe4   : > { %v569_v30 = vadd.f32 %v568_v22, %v554_v21  ;;  %v532_v32 = vadd.f32 %v531_v20, %v516_v27  ;;  %v555_v33 = vmul.f32 %v516_v27, %v304_v24  ;;  %vm477_vm15 = vcmp.lt.s32.totalorder %v461_v59, 288 }
  0xe5   : > { %771 = vst [vmem:[%s932_s5 + $0x10] sm:$0xff] %v743_v26   ;;  %775 = vst [vmem:[%s932_s5 + $0x30] sm:$0xff] %v763_v42   ;;  %v524_v7 = vsel %vm476_vm14, %v336_v37, 0.0  ;;  %v562_v2 = vmul.f32 %v523_v3, %v333_v19  ;;  %v525_v10 = vsel %vm477_vm15, %v957_v11, 0.0  ;;  %v526_v43 = vsel %vm478_vm0, %v806_v29, 0.0 }
  0xe6   : > { %v533_v40 = vadd.f32 %v532_v32, %v517_v25  ;;  %v570_v41 = vadd.f32 %v569_v30, %v555_v33  ;;  %v563_v13 = vmul.f32 %v524_v7, %v336_v37  ;;  %v564_v14 = vmul.f32 %v957_v11, %v525_v10 }
  0xe7   : > { %v565_v56 = vmul.f32 %v806_v29, %v526_v43 }
  0xe8   : > { %v534_v47 = vadd.f32 %v533_v40, %v518_v35  ;;  %v571_v49 = vadd.f32 %v570_v41, %v556_v39 }
  0xea   : > { %v572_v54 = vadd.f32 %v571_v49, %v557_v46  ;;  %v535_v55 = vadd.f32 %v534_v47, %v519_v44 }
  0xec   : > { %v536_v60 = vadd.f32 %v535_v55, %v520_v51  ;;  %v573_v62 = vadd.f32 %v572_v54, %v558_v53 }
  0xee   : > { %v537_v0 = vadd.f32 %v536_v60, %v521_v58  ;;  %v574_v1 = vadd.f32 %v573_v62, %v559_v61 }
  0xf0   : > { %v575_v5 = vadd.f32 %v574_v1, %v560_v48  ;;  %v538_v6 = vadd.f32 %v537_v0, %v522_v63 }
  0xf2   : > { %v539_v8 = vadd.f32 %v538_v6, %v523_v3  ;;  %v576_v9 = vadd.f32 %v575_v5, %v561_v4 }
  0xf4   : > { %v577_v12 = vadd.f32 %v576_v9, %v562_v2  ;;  %v540_v31 = vadd.f32 %v539_v8, %v524_v7 }
  0xf6   : > { %v541_v15 = vadd.f32 %v540_v31, %v525_v10  ;;  %v578_v16 = vadd.f32 %v577_v12, %v563_v13 }
  0xf8   : > { %v542_v17 = vadd.f32 %v541_v15, %v526_v43  ;;  %v579_v18 = vadd.f32 %v578_v16, %v564_v14 }
  0xfa   : > { %v543_v20 = vrot.slane %v542_v17, 4  ;;  %v580_v21 = vadd.f32 %v579_v18, %v565_v56 }
  0xfc   : > { %v544_v19 = vadd.f32 %v543_v20, %v542_v17  ;;  %v581_v22 = vrot.slane %v580_v21, 4 }
  0xfe   : > { %v545_v23 = vrot.slane %v544_v19, 2  ;;  %v582_v24 = vadd.f32 %v581_v22, %v580_v21 }
 0x100   : > { %v546_v25 = vadd.f32 %v545_v23, %v544_v19  ;;  %v583_v26 = vrot.slane %v582_v24, 2 }
 0x102   : > { %v547_v27 = vrot.slane %v546_v25, 1  ;;  %v584_v30 = vadd.f32 %v583_v26, %v582_v24 }
 0x104   : > { %v548_v32 = vadd.f32 %v547_v27, %v546_v25  ;;  %v585_v33 = vrot.slane %v584_v30, 1 }
 0x106   : > { %549 = vst [vmem:[%s905_s27] sm:$0x1] %v548_v32  ;;  %v586_v11 = vadd.f32 %v585_v33, %v584_v30 }
 0x108   : > { %587 = vst [vmem:[%s905_s27 + $0x1] sm:$0x1] %v586_v11 }
 0x109 PF: > { %s14_s12 = sadd.s32 1, %s828_s12  }
 0x10a   : > { %p11_p5 = scmp.ge.s32.totalorder %s14_s12, 5  }
 0x10c   :  { %13 = sbr.rel (!%p11_p5) target bundleno = 1 (0x1), region = 70 }

// kernel: generator_forward.6
= control target key start
LH: loop header
LB: loop body
LE: loop exit
PB: predicated region body
PF: predicated region fallthrough
CT: control target
= control target key end

     0   :  { %s1040_s15 = smov 0   ;;  %s1348_s0 = inlined_call_operand.vmem [shape: bf16[384,128], index: 0, kind: input, shape index: {}]   ;;  %s1349_s1 = inlined_call_operand.vmem [shape: f32[2,128], index: 1, kind: input, shape index: {}]   ;;  %s1350_s2 = inlined_call_operand.vmem [shape: bf16[128,64], index: 2, kind: input, shape index: {}]   ;;  %s1351_s3 = inlined_call_operand.vmem [shape: bf16[384,64], index: 3, kind: output, shape index: {0}]   ;;  %s1352_s4 = inlined_call_operand.vmem [shape: f32[24,64], index: 4, kind: output, shape index: {1}]  }
   0x1 LB: > { %s1046_s16 = sadd.s32 4294967295, %s1012_s15   ;;  %p837_p0 = scmp.ge.s32.totalorder %s1012_s15, 1  ;;  %s1012_s15 = sphi %s1040_s15, %s15_s15  }
   0x2   : > { %p166_p1 = scmp.lt.s32.totalorder %s1012_s15, 4 }
   0x4   : > { %p167_p2 = pnand %p837_p0, %p166_p1 }
   0x5   : > { %s838_s19 = sshll.u32 (!%p167_p2), %s1046_s16, 4  ;;  %p208_p4 = scmp.lt.s32.totalorder (!%p167_p2), %s1046_s16, 2 }
   0x6   : > { %170 = sbr.rel (%p167_p2) target bundleno = 290 (0x122), region = 32  ;;  %p197_p3 = scmp.lt.s32.totalorder (!%p167_p2), %s838_s19, 47 }
   0x7   : > { %s867_s22 = sshll.u32 (!%p167_p2), %s1046_s16, 7 }
   0xb   : > { %v998_v0 = vld [vmem:[%s1350_s2 + $0x38] sm:$0xff]   ;;  %v246_v1 = vlaneseq  ;;  %v999_v2 = vld [vmem:[%s1350_s2 + $0x30] sm:$0xff]   ;;  %s1354_s19 = smov (!%p197_p3, %s838_s19), 47  ;;  %v1000_v4 = vld [vmem:[%s1350_s2 + $0x28] sm:$0xff]   ;;  %vm651_vm0 = vcmask 523264   ;;  %vm535_vm1 = vcmask 519168  }
   0xc   : > { %941 = vmatprep.subr.bf16.mxu0 %v998_v0  ;;  %973 = vmatprep.subr.bf16.mxu1 %v998_v0  ;;  %s839_s24 = sshll.u32 %s1354_s19, 2  ;;  %v1001_v7 = vld [vmem:[%s1350_s2 + $0x20] sm:$0xff]   ;;  %v1002_v21 = vld [vmem:[%s1350_s2 + $0x18] sm:$0xff]   ;;  %v1003_v33 = vld [vmem:[%s1350_s2 + $0x10] sm:$0xff]  }
   0xd   : > { %v1057_v3 = vshrl.u32 %v246_v1, 7  ;;  %942 = vmatpush3.bf16.msra.mxu0 %v998_v0  ;;  %981 = vmatpush3.bf16.msra.mxu1 %v998_v0  ;;  %s1071_s27 = scalar_lea.vmem %s1348_s0, %s839_s24  ;;  %v245_v9 = vld [vmem:[%s1349_s1] sm:$0x3]  ;;  %v1004_v49 = vld [vmem:[%s1350_s2 + $0x8] sm:$0xff]   ;;  %s1169_s25 = scalar_lea.vmem %s1351_s3, %s839_s24 }
   0xe   : > { %943 = vmatprep.subr.bf16.mxu0 %v999_v2  ;;  %974 = vmatprep.subr.bf16.mxu1 %v999_v2  ;;  %v887_v8 = vld [vmem:[%s1071_s27] sm:$0xff]   ;;  %v918_v10 = vld [vmem:[%s1071_s27 + $0x8] sm:$0xff]   ;;  %v919_v15 = vld [vmem:[%s1071_s27 + $0x10] sm:$0xff]   ;;  %s209_s14 = scalar_select %p208_p4, %s1046_s16, 2 }
   0xf   : > { %v248_v5 = vsub.s32 0, %v1057_v3  ;;  %v268_v6 = vsub.s32 1, %v1057_v3  ;;  %v888_v11 = vunpack.c.l.bf16 %v887_v8  ;;  %v889_v12 = vunpack.c.h.bf16 %v887_v8  ;;  %v921_v20 = vld [vmem:[%s1071_s27 + $0x20] sm:$0xff]   ;;  %v920_v27 = vld [vmem:[%s1071_s27 + $0x18] sm:$0xff]   ;;  %v922_v32 = vld [vmem:[%s1071_s27 + $0x28] sm:$0xff]  }
  0x10   : > { %v892_v16 = vunpack.c.l.bf16 %v918_v10  ;;  %v893_v19 = vunpack.c.h.bf16 %v918_v10  ;;  %v896_v22 = vunpack.c.l.bf16 %v919_v15  ;;  %v897_v26 = vunpack.c.h.bf16 %v919_v15  ;;  %v923_v35 = vld [vmem:[%s1071_s27 + $0x30] sm:$0xff]   ;;  %v924_v44 = vld [vmem:[%s1071_s27 + $0x38] sm:$0xff]   ;;  %s842_s17 = sshll.u32 %s209_s14, 3 }
  0x11   : > { %944 = vmatpush3.bf16.msra.mxu0 %v999_v2  ;;  %982 = vmatpush3.bf16.msra.mxu1 %v999_v2  ;;  %v1082_v13 = vrot.slane %v245_v9, %v248_v5  ;;  %v1084_v14 = vrot.slane %v245_v9, %v268_v6  ;;  %v904_v28 = vunpack.c.l.bf16 %v921_v20  ;;  %v900_v37 = vunpack.c.l.bf16 %v920_v27  ;;  %v1005_v2 = vld [vmem:[%s1350_s2] sm:$0xff]   ;;  %s1141_s21 = scalar_lea.vmem %s1352_s4, %s842_s17 }
  0x12   : > { %945 = vmatprep.subr.bf16.mxu0 %v1000_v4  ;;  %975 = vmatprep.subr.bf16.mxu1 %v1000_v4  ;;  %v901_v38 = vunpack.c.h.bf16 %v920_v27  ;;  %v905_v39 = vunpack.c.h.bf16 %v921_v20  ;;  %v908_v43 = vunpack.c.l.bf16 %v922_v32  ;;  %v909_v47 = vunpack.c.h.bf16 %v922_v32 }
  0x13   : > { %v250_v17 = vmul.f32 %v888_v11, %v1082_v13  ;;  %v251_v18 = vmul.f32 %v889_v12, %v1082_v13  ;;  %v252_v25 = vmul.f32 %v892_v16, %v1082_v13  ;;  %v253_v31 = vmul.f32 %v893_v19, %v1082_v13 }
  0x14   : > { %v254_v34 = vmul.f32 %v896_v22, %v1082_v13  ;;  %v255_v41 = vmul.f32 %v897_v26, %v1082_v13  ;;  %v258_v42 = vmul.f32 %v904_v28, %v1082_v13  ;;  %v259_v46 = vmul.f32 %v905_v39, %v1082_v13 }
  0x15   : > { %946 = vmatpush3.bf16.msra.mxu0 %v1000_v4  ;;  %983 = vmatpush3.bf16.msra.mxu1 %v1000_v4  ;;  %v270_v23 = vadd.f32 %v1084_v14, %v250_v17  ;;  %v271_v24 = vadd.f32 %v1084_v14, %v251_v18  ;;  %v272_v40 = vadd.f32 %v1084_v14, %v252_v25  ;;  %v912_v48 = vunpack.c.l.bf16 %v923_v35 }
  0x16   : > { %947 = vmatprep.subr.bf16.mxu0 %v1001_v7  ;;  %976 = vmatprep.subr.bf16.mxu1 %v1001_v7  ;;  %v273_v45 = vadd.f32 %v1084_v14, %v253_v31  ;;  %v274_v50 = vadd.f32 %v1084_v14, %v254_v34  ;;  %v278_v51 = vadd.f32 %v1084_v14, %v258_v42  ;;  %v913_v53 = vunpack.c.h.bf16 %v923_v35 }
  0x17   : > { %v286_v29 = vmax.f32 %v270_v23, 0.0  ;;  %v287_v30 = vmax.f32 %v271_v24, 0.0  ;;  %v260_v52 = vmul.f32 %v908_v43, %v1082_v13  ;;  %v279_v54 = vadd.f32 %v1084_v14, %v259_v46 }
  0x18   : > { %v261_v55 = vmul.f32 %v909_v47, %v1082_v13  ;;  %v262_v56 = vmul.f32 %v912_v48, %v1082_v13  ;;  %v916_v57 = vunpack.c.l.bf16 %v924_v44  ;;  %v294_v58 = vmax.f32 %v278_v51, 0.0 }
  0x19   : > { %948 = vmatpush3.bf16.msra.mxu0 %v1001_v7  ;;  %984 = vmatpush3.bf16.msra.mxu1 %v1001_v7  ;;  %v302_v36 = vpack.c.bf16 %v287_v30, %v286_v29  ;;  %v280_v59 = vadd.f32 %v1084_v14, %v260_v52  ;;  %v263_v60 = vmul.f32 %v913_v53, %v1082_v13  ;;  %v917_v61 = vunpack.c.h.bf16 %v924_v44 }
  0x1a   : > { %949 = vmatprep.subr.bf16.mxu0 %v1002_v21  ;;  %977 = vmatprep.subr.bf16.mxu1 %v1002_v21  ;;  %v275_v62 = vadd.f32 %v1084_v14, %v255_v41  ;;  %v295_v63 = vmax.f32 %v279_v54, 0.0  ;;  %v281_v0 = vadd.f32 %v1084_v14, %v261_v55  ;;  %v282_v1 = vadd.f32 %v1084_v14, %v262_v56 }
  0x1b   : > { %957 = vmatprep.mubr.bf16.mxu0 %v302_v36  ;;  %v256_v4 = vmul.f32 %v900_v37, %v1082_v13  ;;  %v283_v5 = vadd.f32 %v1084_v14, %v263_v60  ;;  %v288_v6 = vmax.f32 %v272_v40, 0.0  ;;  %v289_v7 = vmax.f32 %v273_v45, 0.0 }
  0x1c   : > { %v257_v8 = vmul.f32 %v901_v38, %v1082_v13  ;;  %v306_v9 = vpack.c.bf16 %v295_v63, %v294_v58  ;;  %v296_v10 = vmax.f32 %v280_v59, 0.0  ;;  %v297_v11 = vmax.f32 %v281_v0, 0.0 }
  0x1d   : > { %950 = vmatpush3.bf16.msra.mxu0 %v1002_v21  ;;  %985 = vmatpush3.bf16.msra.mxu1 %v1002_v21  ;;  %v264_v12 = vmul.f32 %v916_v57, %v1082_v13  ;;  %v265_v15 = vmul.f32 %v917_v61, %v1082_v13  ;;  %v290_v16 = vmax.f32 %v274_v50, 0.0  ;;  %v291_v17 = vmax.f32 %v275_v62, 0.0 }
  0x1e   : > { %951 = vmatprep.subr.bf16.mxu0 %v1003_v33  ;;  %978 = vmatprep.subr.bf16.mxu1 %v1003_v33  ;;  %v298_v18 = vmax.f32 %v282_v1, 0.0  ;;  %v299_v19 = vmax.f32 %v283_v5, 0.0  ;;  %v276_v20 = vadd.f32 %v1084_v14, %v256_v4  ;;  %v277_v21 = vadd.f32 %v1084_v14, %v257_v8 }
  0x1f   : > { %965 = vmatprep.mubr.bf16.mxu1 %v306_v9  ;;  %v303_v22 = vpack.c.bf16 %v289_v7, %v288_v6  ;;  %v307_v23 = vpack.c.bf16 %v297_v11, %v296_v10  ;;  %v284_v24 = vadd.f32 %v1084_v14, %v264_v12  ;;  %v285_v25 = vadd.f32 %v1084_v14, %v265_v15 }
  0x20   : > { %v304_v13 = vpack.c.bf16 %v291_v17, %v290_v16  ;;  %v308_v26 = vpack.c.bf16 %v299_v19, %v298_v18  ;;  %v292_v27 = vmax.f32 %v276_v20, 0.0  ;;  %v293_v28 = vmax.f32 %v277_v21, 0.0 }
  0x21   : > { %952 = vmatpush3.bf16.msra.mxu0 %v1003_v33  ;;  %986 = vmatpush3.bf16.msra.mxu1 %v1003_v33  ;;  %v300_v29 = vmax.f32 %v284_v24, 0.0  ;;  %v301_v30 = vmax.f32 %v285_v25, 0.0  ;;  %v1014_v14 = vmov 0.0   ;;  %v555_v33 = vadd.s32 16, %v1057_v3 }
  0x22   : > { %953 = vmatprep.subr.bf16.mxu0 %v1004_v49  ;;  %979 = vmatprep.subr.bf16.mxu1 %v1004_v49  ;;  %v305_v31 = vpack.c.bf16 %v293_v28, %v292_v27  ;;  %652 = vst.msk [vmem:[%s1141_s21] sm:$0xff] %vm651_vm0, %v1014_v14  ;;  %v1147_v34 = vstv %s867_s22  ;;  %v556_v35 = vadd.s32 24, %v1057_v3  ;;  %v554_v36 = vadd.s32 8, %v1057_v3 }
  0x23   : > { %v309_v32 = vpack.c.bf16 %v301_v30, %v300_v29  ;;  %v571_v37 = vadd.s32 %v1147_v34, %v1057_v3  ;;  %v559_v38 = vadd.s32 48, %v1057_v3  ;;  %v557_v39 = vadd.s32 32, %v1057_v3 }
  0x24   : > { %v560_v40 = vadd.s32 56, %v1057_v3  ;;  %v558_v41 = vadd.s32 40, %v1057_v3  ;;  %v573_v42 = vadd.s32 %v1147_v34, %v555_v33  ;;  %v574_v43 = vadd.s32 %v1147_v34, %v556_v35 }
  0x25   : > { %954 = vmatpush3.bf16.msra.mxu0 %v1004_v49  ;;  %987 = vmatpush3.bf16.msra.mxu1 %v1004_v49  ;;  %v572_v44 = vadd.s32 %v1147_v34, %v554_v36  ;;  %v561_v45 = vadd.s32 64, %v1057_v3  ;;  %vm587_vm2 = vcmp.lt.s32.totalorder %v571_v37, 288  ;;  %v1162_v46 = vadd.s32 %v1147_v34, %v559_v38 }
  0x26   : > { %955 = vmatprep.subr.bf16.mxu0 %v1005_v2  ;;  %980 = vmatprep.subr.bf16.mxu1 %v1005_v2  ;;  %v563_v49 = vadd.s32 80, %v1057_v3  ;;  %v1175_v50 = vadd.s32 %v1147_v34, %v557_v39  ;;  %v1178_v51 = vadd.s32 %v1147_v34, %v560_v40  ;;  %v562_v52 = vadd.s32 72, %v1057_v3 }
  0x27   : > { %v564_v55 = vadd.s32 88, %v1057_v3  ;;  %v1185_v56 = vadd.s32 %v1147_v34, %v558_v41  ;;  %vm589_vm3 = vcmp.lt.s32.totalorder %v573_v42, 288  ;;  %vm590_vm4 = vcmp.lt.s32.totalorder %v574_v43, 288 }
  0x28   : > { %vm588_vm5 = vcmp.lt.s32.totalorder %v572_v44, 288  ;;  %v1190_v59 = vadd.s32 %v1147_v34, %v561_v45  ;;  %vm593_vm6 = vcmp.lt.s32.totalorder %v1162_v46, 288  ;;  %v1201_v0 = vadd.s32 %v1147_v34, %v563_v49 }
  0x29   : > { %956 = vmatpush3.bf16.msra.mxu0 %v1005_v2  ;;  %988 = vmatpush3.bf16.msra.mxu1 %v1005_v2  ;;  %vm591_vm7 = vcmp.lt.s32.totalorder %v1175_v50, 288  ;;  %vm594_vm8 = vcmp.lt.s32.totalorder %v1178_v51, 288  ;;  %v1208_v2 = vadd.s32 %v1147_v34, %v562_v52  ;;  %v1216_v6 = vadd.s32 %v1147_v34, %v564_v55 }
  0x2a   : > { %vm592_vm9 = vcmp.lt.s32.totalorder %v1185_v56, 288  ;;  %vm595_vm10 = vcmp.lt.s32.totalorder %v1190_v59, 288  ;;  %v567_v11 = vadd.s32 112, %v1057_v3  ;;  %v565_v12 = vadd.s32 96, %v1057_v3 }
  0x2b   : > { %v1231_v18 = vadd.s32 120, %v1057_v3  ;;  %vm596_vm11 = vcmp.lt.s32.totalorder %v1208_v2, 288  ;;  %v566_v27 = vadd.s32 104, %v1057_v3  ;;  %vm597_vm12 = vcmp.lt.s32.totalorder %v1201_v0, 288 }
  0x2c   : > { %958 = vmatmul.mubr.bf16.vlgmr.msra.gmra.mxu0 %v303_v22  ;;  %966 = vmatmul.mubr.bf16.vlgmr.msra.gmra.mxu1 %v307_v23  ;;  %vm598_vm13 = vcmp.lt.s32.totalorder %v1216_v6, 288  ;;  %v1261_v41 = vadd.s32 %v1147_v34, %v567_v11 }
  0x2d   : > { %961 = vmatprep.mubr.bf16.mxu0 %v304_v13  ;;  %969 = vmatprep.mubr.bf16.mxu1 %v308_v26  ;;  %v586_v0 = vadd.s32 %v1147_v34, %v1231_v18 }
  0x34   : > { %962 = vmatmul.mubr.bf16.gmra.mxu0 %v305_v31  ;;  %970 = vmatmul.mubr.bf16.gmra.mxu1 %v309_v32 }
  0xec   : > { %v959_v47 = vpop.f32.mrf.mxu0  ;;  %v1171_v48 = vpop.f32.mrf.mxu1 }
  0xed   : > { %v872_v53 = vpack.c.bf16 %v959_v47, %v959_v47  ;;  %v880_v54 = vpack.c.bf16 %v1171_v48, %v1171_v48  ;;  %v637_v4 = vsel %vm589_vm3, %v959_v47, 0.0  ;;  %v645_v2 = vsel %vm597_vm12, %v1171_v48, 0.0 }
  0xee   : > { %v408_v57 = vpop.f32.mrf.mxu0  ;;  %v1187_v58 = vpop.f32.mrf.mxu1  ;;  %v694_v19 = vmul.f32 %v959_v47, %v637_v4  ;;  %v656_v25 = vsel %vm651_vm0, %v637_v4, 0.0  ;;  %v672_v6 = vsel %vm651_vm0, %v645_v2, 0.0  ;;  %vm690_vm3 = vcmask 516096  }
  0xef   : > { %538 = vst.msk [vmem:[%s1169_s25 + $0x8] sm:$0xf] %vm535_vm1, %v872_v53  ;;  %v870_v60 = vpack.c.bf16 %v408_v57, %v408_v57  ;;  %v635_v61 = vsel %vm587_vm2, %v408_v57, 0.0  ;;  %546 = vst.msk [vmem:[%s1169_s25 + $0x28] sm:$0xf] %vm535_vm1, %v880_v54  ;;  %v878_v62 = vpack.c.bf16 %v1187_v58, %v1187_v58  ;;  %v583_v53 = vadd.s32 %v1147_v34, %v565_v12 }
  0xf0   : > { %v960_v63 = vpop.f32.mrf.mxu0  ;;  %v1205_v1 = vpop.f32.mrf.mxu1  ;;  %v692_v7 = vmul.f32 %v635_v61, %v408_v57  ;;  %v653_v20 = vsel %vm651_vm0, %v635_v61, 0.0  ;;  %v711_v37 = vsel %vm651_vm0, %v694_v19, 0.0  ;;  %v584_v19 = vadd.s32 %v1147_v34, %v566_v27 }
  0xf1   : > { %536 = vst.msk [vmem:[%s1169_s25] sm:$0xf] %vm535_vm1, %v870_v60  ;;  %v873_v5 = vpack.c.bf16 %v960_v63, %v960_v63  ;;  %544 = vst.msk [vmem:[%s1169_s25 + $0x20] sm:$0xf] %vm535_vm1, %v878_v62  ;;  %v881_v9 = vpack.c.bf16 %v1205_v1, %v1205_v1  ;;  %v638_v15 = vsel %vm590_vm4, %v960_v63, 0.0  ;;  %vm599_vm14 = vcmp.lt.s32.totalorder %v583_v53, 288 }
  0xf2   : > { %v411_v8 = vpop.f32.mrf.mxu0  ;;  %v1222_v10 = vpop.f32.mrf.mxu1  ;;  %v708_v28 = vsel %vm651_vm0, %v692_v7, 0.0  ;;  %v695_v29 = vmul.f32 %v960_v63, %v638_v15  ;;  %v658_v38 = vsel %vm651_vm0, %v638_v15, 0.0  ;;  %vm600_vm15 = vcmp.lt.s32.totalorder %v584_v19, 288 }
  0xf3   : > { %539 = vst.msk [vmem:[%s1169_s25 + $0xc] sm:$0xf] %vm535_vm1, %v873_v5  ;;  %v871_v16 = vpack.c.bf16 %v411_v8, %v411_v8  ;;  %v636_v17 = vsel %vm588_vm5, %v411_v8, 0.0  ;;  %547 = vst.msk [vmem:[%s1169_s25 + $0x2c] sm:$0xf] %vm535_vm1, %v881_v9  ;;  %v879_v32 = vpack.c.bf16 %v1222_v10, %v1222_v10  ;;  %v643_v5 = vsel %vm595_vm10, %v1187_v58, 0.0 }
  0xf4   : > { %v654_v21 = vsel %vm651_vm0, %v636_v17, 0.0  ;;  %v693_v22 = vmul.f32 %v636_v17, %v411_v8  ;;  %v963_v23 = vpop.f32.mrf.mxu0  ;;  %v1238_v24 = vpop.f32.mrf.mxu1  ;;  %v713_v47 = vsel %vm651_vm0, %v695_v29, 0.0  ;;  %v644_v59 = vsel %vm596_vm11, %v1222_v10, 0.0 }
  0xf5   : > { %537 = vst.msk [vmem:[%s1169_s25 + $0x4] sm:$0xf] %vm535_vm1, %v871_v16  ;;  %v655_v13 = vadd.f32 %v654_v21, %v653_v20  ;;  %v876_v26 = vpack.c.bf16 %v963_v23, %v963_v23  ;;  %545 = vst.msk [vmem:[%s1169_s25 + $0x24] sm:$0xf] %vm535_vm1, %v879_v32  ;;  %v641_v43 = vsel %vm593_vm6, %v963_v23, 0.0  ;;  %v884_v56 = vpack.c.bf16 %v1238_v24, %v1238_v24 }
  0xf6   : > { %v709_v30 = vsel %vm651_vm0, %v693_v22, 0.0  ;;  %v424_v31 = vpop.f32.mrf.mxu0  ;;  %v1249_v14 = vpop.f32.mrf.mxu1  ;;  %v698_v61 = vmul.f32 %v963_v23, %v641_v43  ;;  %v664_v8 = vsel %vm651_vm0, %v641_v43, 0.0  ;;  %v700_v21 = vmul.f32 %v643_v5, %v1187_v58 }
  0xf7   : > { %v657_v33 = vadd.f32 %v656_v25, %v655_v13  ;;  %v710_v35 = vadd.f32 %v709_v30, %v708_v28  ;;  %542 = vst.msk [vmem:[%s1169_s25 + $0x18] sm:$0xf] %vm535_vm1, %v876_v26  ;;  %v874_v3 = vpack.c.bf16 %v424_v31, %v424_v31  ;;  %v639_v36 = vsel %vm591_vm7, %v424_v31, 0.0  ;;  %550 = vst.msk [vmem:[%s1169_s25 + $0x38] sm:$0xf] %vm535_vm1, %v884_v56 }
  0xf8   : > { %v696_v39 = vmul.f32 %v639_v36, %v424_v31  ;;  %v964_v40 = vpop.f32.mrf.mxu0  ;;  %v660_v49 = vsel %vm651_vm0, %v639_v36, 0.0  ;;  %v1272_v54 = vpop.f32.mrf.mxu1  ;;  %v882_v12 = vpack.c.bf16 %v1249_v14, %v1249_v14  ;;  %v719_v20 = vsel %vm651_vm0, %v698_v61, 0.0 }
  0xf9   : > { %v712_v42 = vadd.f32 %v711_v37, %v710_v35  ;;  %540 = vst.msk [vmem:[%s1169_s25 + $0x10] sm:$0xf] %vm535_vm1, %v874_v3  ;;  %v659_v44 = vadd.f32 %v658_v38, %v657_v33  ;;  %v877_v45 = vpack.c.bf16 %v964_v40, %v964_v40  ;;  %v642_v50 = vsel %vm594_vm8, %v964_v40, 0.0 }
  0xfa   : > { %v427_v52 = vpop.f32.mrf.mxu0  ;;  %v715_v62 = vsel %vm651_vm0, %v696_v39, 0.0  ;;  %v699_v9 = vmul.f32 %v964_v40, %v642_v50  ;;  %v459_v15 = vpop.f32.mrf.mxu1  ;;  %v666_v22 = vsel %vm651_vm0, %v642_v50, 0.0  ;;  %548 = vst.msk [vmem:[%s1169_s25 + $0x30] sm:$0xf] %vm535_vm1, %v882_v12  ;;  %v885_v23 = vpack.c.bf16 %v1272_v54, %v1272_v54 }
  0xfb   : > { %v661_v55 = vadd.f32 %v660_v49, %v659_v44  ;;  %v714_v46 = vadd.f32 %v713_v47, %v712_v42  ;;  %543 = vst.msk [vmem:[%s1169_s25 + $0x1c] sm:$0xf] %vm535_vm1, %v877_v45  ;;  %v875_v57 = vpack.c.bf16 %v427_v52, %v427_v52  ;;  %v640_v60 = vsel %vm592_vm9, %v427_v52, 0.0 }
  0xfc   : > { %v662_v51 = vsel %vm651_vm0, %v640_v60, 0.0  ;;  %v697_v63 = vmul.f32 %v640_v60, %v427_v52  ;;  %v883_v26 = vpack.c.bf16 %v459_v15, %v459_v15  ;;  %v668_v27 = vsel %vm651_vm0, %v643_v5, 0.0  ;;  %551 = vst.msk [vmem:[%s1169_s25 + $0x3c] sm:$0xf] %vm535_vm1, %v885_v23 }
  0xfd   : > { %v716_v4 = vadd.f32 %v715_v62, %v714_v46  ;;  %541 = vst.msk [vmem:[%s1169_s25 + $0x14] sm:$0xf] %vm535_vm1, %v875_v57  ;;  %v663_v7 = vadd.f32 %v662_v51, %v661_v55  ;;  %v721_v28 = vsel %vm651_vm0, %v699_v9, 0.0  ;;  %v701_v58 = vmul.f32 %v644_v59, %v1222_v10 }
  0xfe   : > { %v717_v11 = vsel %vm651_vm0, %v697_v63, 0.0  ;;  %v646_v29 = vsel %vm598_vm13, %v1205_v1, 0.0  ;;  %549 = vst.msk [vmem:[%s1169_s25 + $0x34] sm:$0xf] %vm535_vm1, %v883_v26  ;;  %v702_v32 = vmul.f32 %v1171_v48, %v645_v2  ;;  %v723_v33 = vsel %vm651_vm0, %v700_v21, 0.0 }
  0xff   : > { %v665_v16 = vadd.f32 %v664_v8, %v663_v7  ;;  %v718_v17 = vadd.f32 %v717_v11, %v716_v4  ;;  %v670_v10 = vsel %vm651_vm0, %v644_v59, 0.0  ;;  %v647_v36 = vsel %vm599_vm14, %v1249_v14, 0.0 }
 0x100   : > { %v703_v37 = vmul.f32 %v1205_v1, %v646_v29  ;;  %v725_v38 = vsel %vm651_vm0, %v701_v58, 0.0  ;;  %vm601_vm2 = vcmp.lt.s32.totalorder %v1261_v41, 288  ;;  %v648_v48 = vsel %vm600_vm15, %v459_v15, 0.0 }
 0x101   : > { %v667_v25 = vadd.f32 %v666_v22, %v665_v16  ;;  %v720_v13 = vadd.f32 %v719_v20, %v718_v17  ;;  %v727_v39 = vsel %vm651_vm0, %v702_v32, 0.0  ;;  %v674_v40 = vsel %vm651_vm0, %v646_v29, 0.0 }
 0x102   : > { %v704_v42 = vmul.f32 %v647_v36, %v1249_v14  ;;  %vm602_vm1 = vcmp.lt.s32.totalorder %v586_v0, 288  ;;  %v649_v44 = vsel %vm601_vm2, %v1238_v24, 0.0  ;;  %v729_v1 = vsel %vm651_vm0, %v703_v37, 0.0 }
 0x103   : > { %v722_v30 = vadd.f32 %v721_v28, %v720_v13  ;;  %v669_v31 = vadd.f32 %v668_v27, %v667_v25  ;;  %v676_v47 = vsel %vm651_vm0, %v647_v36, 0.0  ;;  %v705_v49 = vmul.f32 %v648_v48, %v459_v15 }
 0x104   : > { %v650_v52 = vsel %vm602_vm1, %v1272_v54, 0.0  ;;  %v706_v53 = vmul.f32 %v1238_v24, %v649_v44  ;;  %v731_v55 = vsel %vm651_vm0, %v704_v42, 0.0  ;;  %v678_v14 = vsel %vm651_vm0, %v648_v48, 0.0 }
 0x105   : > { %v671_v35 = vadd.f32 %v670_v10, %v669_v31  ;;  %v724_v3 = vadd.f32 %v723_v33, %v722_v30  ;;  %v680_v60 = vsel %vm651_vm0, %v649_v44, 0.0  ;;  %v707_v61 = vmul.f32 %v1272_v54, %v650_v52 }
 0x106   : > { %v733_v62 = vsel %vm651_vm0, %v705_v49, 0.0  ;;  %v735_v4 = vsel %vm651_vm0, %v706_v53, 0.0  ;;  %v682_v5 = vsel %vm651_vm0, %v650_v52, 0.0 }
 0x107   : > { %v673_v34 = vadd.f32 %v672_v6, %v671_v35  ;;  %v726_v18 = vadd.f32 %v725_v38, %v724_v3  ;;  %v737_v56 = vsel %vm651_vm0, %v707_v61, 0.0 }
 0x109   : > { %v728_v43 = vadd.f32 %v727_v39, %v726_v18  ;;  %v675_v45 = vadd.f32 %v674_v40, %v673_v34 }
 0x10b   : > { %v677_v41 = vadd.f32 %v676_v47, %v675_v45  ;;  %v730_v50 = vadd.f32 %v729_v1, %v728_v43 }
 0x10d   : > { %v732_v46 = vadd.f32 %v731_v55, %v730_v50  ;;  %v679_v57 = vadd.f32 %v678_v14, %v677_v41 }
 0x10f   : > { %v681_v51 = vadd.f32 %v680_v60, %v679_v57  ;;  %v734_v63 = vadd.f32 %v733_v62, %v732_v46 }
 0x111   : > { %v683_v7 = vadd.f32 %v682_v5, %v681_v51  ;;  %v736_v24 = vadd.f32 %v735_v4, %v734_v63 }
 0x113   : > { %v684_v8 = vrot.slane %v683_v7, 4  ;;  %v738_v9 = vadd.f32 %v737_v56, %v736_v24 }
 0x115   : > { %v685_v11 = vadd.f32 %v684_v8, %v683_v7  ;;  %v739_v12 = vrot.slane %v738_v9, 4 }
 0x117   : > { %v686_v15 = vrot.slane %v685_v11, 2  ;;  %v740_v54 = vadd.f32 %v739_v12, %v738_v9 }
 0x119   : > { %v687_v16 = vadd.f32 %v686_v15, %v685_v11  ;;  %v741_v17 = vrot.slane %v740_v54, 2 }
 0x11b   : > { %v688_v59 = vrot.slane %v687_v16, 1  ;;  %v742_v19 = vadd.f32 %v741_v17, %v740_v54 }
 0x11d   : > { %v689_v20 = vadd.f32 %v688_v59, %v687_v16  ;;  %v743_v21 = vrot.slane %v742_v19, 1 }
 0x11f   : > { %691 = vst.msk [vmem:[%s1141_s21] sm:$0x1] %vm690_vm3, %v689_v20  ;;  %v744_v22 = vadd.f32 %v743_v21, %v742_v19 }
 0x121   : > { %745 = vst.msk [vmem:[%s1141_s21 + $0x1] sm:$0x1] %vm690_vm3, %v744_v22 }
 0x122 PF: > { %s15_s15 = sadd.s32 1, %s1012_s15  }
 0x123   : > { %p12_p5 = scmp.ge.s32.totalorder %s15_s15, 5  }
 0x125   :  { %14 = sbr.rel (!%p12_p5) target bundleno = 1 (0x1), region = 74 }

// kernel: generator_forward.7
= control target key start
LH: loop header
LB: loop body
LE: loop exit
PB: predicated region body
PF: predicated region fallthrough
CT: control target
= control target key end

     0   :  { %s1013_s15 = smov 0   ;;  %s1289_s0 = inlined_call_operand.vmem [shape: bf16[384,64], index: 0, kind: input, shape index: {}]   ;;  %s1290_s1 = inlined_call_operand.vmem [shape: f32[2,64], index: 1, kind: input, shape index: {}]   ;;  %s1291_s2 = inlined_call_operand.vmem [shape: bf16[64,32], index: 2, kind: input, shape index: {}]   ;;  %s1292_s3 = inlined_call_operand.vmem [shape: bf16[384,32], index: 3, kind: output, shape index: {0}]   ;;  %s1293_s4 = inlined_call_operand.vmem [shape: f32[24,32], index: 4, kind: output, shape index: {1}]  }
   0x1 LB: > { %s1019_s16 = sadd.s32 4294967295, %s985_s15   ;;  %p830_p0 = scmp.ge.s32.totalorder %s985_s15, 1  ;;  %s985_s15 = sphi %s1013_s15, %s15_s15  }
   0x2   : > { %p166_p1 = scmp.lt.s32.totalorder %s985_s15, 4 }
   0x4   : > { %p167_p2 = pnand %p830_p0, %p166_p1 }
   0x5   : > { %s831_s19 = sshll.u32 (!%p167_p2), %s1019_s16, 4  ;;  %p208_p4 = scmp.lt.s32.totalorder (!%p167_p2), %s1019_s16, 2 }
   0x6   : > { %170 = sbr.rel (%p167_p2) target bundleno = 274 (0x112), region = 32  ;;  %p197_p3 = scmp.lt.s32.totalorder (!%p167_p2), %s831_s19, 47 }
   0x7   : > { %s864_s11 = sshll.u32 (!%p167_p2), %s1019_s16, 7 }
   0xb   : > { %v975_v0 = vld [vmem:[%s1291_s2 + $0x18] sm:$0xff]   ;;  %v246_v1 = vlaneseq  ;;  %v976_v2 = vld [vmem:[%s1291_s2 + $0x10] sm:$0xff]   ;;  %s1295_s19 = smov (!%p197_p3, %s831_s19), 47  ;;  %v977_v4 = vld [vmem:[%s1291_s2 + $0x8] sm:$0xff]   ;;  %vm342_vm0 = vcmask 523264   ;;  %vm644_vm1 = vcmask 261120  }
   0xc   : > { %934 = vmatprep.subr.bf16.mxu0 %v975_v0  ;;  %958 = vmatprep.subr.bf16.mxu1 %v975_v0  ;;  %v245_v5 = vld [vmem:[%s1290_s1] sm:$0x3]  ;;  %s832_s26 = sshll.u32 %s1295_s19, 2  ;;  %vm528_vm2 = vcmask 257024  }
   0xd   : > { %v1030_v3 = vshrl.u32 %v246_v1, 7  ;;  %935 = vmatpush3.bf16.msra.mxu0 %v975_v0  ;;  %962 = vmatpush3.bf16.msra.mxu1 %v975_v0  ;;  %s1048_s29 = scalar_lea.vmem %s1289_s0, %s832_s26  ;;  %v978_v13 = vld [vmem:[%s1291_s2] sm:$0xff]   ;;  %s1131_s14 = scalar_lea.vmem %s1292_s3, %s832_s26 }
   0xe   : > { %936 = vmatprep.subr.bf16.mxu0 %v976_v2  ;;  %959 = vmatprep.subr.bf16.mxu1 %v976_v2  ;;  %v884_v9 = vld [vmem:[%s1048_s29] sm:$0xff]   ;;  %v915_v11 = vld [vmem:[%s1048_s29 + $0x8] sm:$0xff]   ;;  %v916_v12 = vld [vmem:[%s1048_s29 + $0x10] sm:$0xff]   ;;  %s209_s6 = scalar_select %p208_p4, %s1019_s16, 2 }
   0xf   : > { %v248_v6 = vsub.s32 0, %v1030_v3  ;;  %v268_v7 = vsub.s32 1, %v1030_v3  ;;  %v885_v14 = vunpack.c.l.bf16 %v884_v9  ;;  %v886_v15 = vunpack.c.h.bf16 %v884_v9  ;;  %v917_v18 = vld [vmem:[%s1048_s29 + $0x18] sm:$0xff]   ;;  %v918_v19 = vld [vmem:[%s1048_s29 + $0x20] sm:$0xff]   ;;  %v919_v44 = vld [vmem:[%s1048_s29 + $0x28] sm:$0xff]  }
  0x10   : > { %v889_v16 = vunpack.c.l.bf16 %v915_v11  ;;  %v890_v17 = vunpack.c.h.bf16 %v915_v11  ;;  %v893_v20 = vunpack.c.l.bf16 %v916_v12  ;;  %v894_v21 = vunpack.c.h.bf16 %v916_v12  ;;  %v920_v49 = vld [vmem:[%s1048_s29 + $0x30] sm:$0xff]   ;;  %v921_v54 = vld [vmem:[%s1048_s29 + $0x38] sm:$0xff]   ;;  %s835_s7 = sshll.u32 %s209_s6, 3 }
  0x11   : > { %v1050_v8 = vrot.slane %v245_v5, %v248_v6  ;;  %937 = vmatpush3.bf16.msra.mxu0 %v976_v2  ;;  %963 = vmatpush3.bf16.msra.mxu1 %v976_v2  ;;  %v1053_v10 = vrot.slane %v245_v5, %v268_v7  ;;  %v897_v22 = vunpack.c.l.bf16 %v917_v18  ;;  %v898_v23 = vunpack.c.h.bf16 %v917_v18  ;;  %s1110_s10 = scalar_lea.vmem %s1293_s4, %s835_s7 }
  0x12   : > { %938 = vmatprep.subr.bf16.mxu0 %v977_v4  ;;  %960 = vmatprep.subr.bf16.mxu1 %v977_v4  ;;  %v901_v31 = vunpack.c.l.bf16 %v918_v19  ;;  %v902_v52 = vunpack.c.h.bf16 %v918_v19  ;;  %v905_v57 = vunpack.c.l.bf16 %v919_v44  ;;  %v906_v58 = vunpack.c.h.bf16 %v919_v44 }
  0x13   : > { %v250_v24 = vmul.f32 %v885_v14, %v1050_v8  ;;  %v251_v25 = vmul.f32 %v886_v15, %v1050_v8  ;;  %v252_v26 = vmul.f32 %v889_v16, %v1050_v8  ;;  %v253_v27 = vmul.f32 %v890_v17, %v1050_v8 }
  0x14   : > { %v254_v28 = vmul.f32 %v893_v20, %v1050_v8  ;;  %v255_v29 = vmul.f32 %v894_v21, %v1050_v8  ;;  %v256_v30 = vmul.f32 %v897_v22, %v1050_v8  ;;  %v257_v38 = vmul.f32 %v898_v23, %v1050_v8 }
  0x15   : > { %939 = vmatpush3.bf16.msra.mxu0 %v977_v4  ;;  %964 = vmatpush3.bf16.msra.mxu1 %v977_v4  ;;  %v270_v32 = vadd.f32 %v1053_v10, %v250_v24  ;;  %v271_v33 = vadd.f32 %v1053_v10, %v251_v25  ;;  %v272_v34 = vadd.f32 %v1053_v10, %v252_v26  ;;  %v909_v61 = vunpack.c.l.bf16 %v920_v49 }
  0x16   : > { %940 = vmatprep.subr.bf16.mxu0 %v978_v13  ;;  %v273_v35 = vadd.f32 %v1053_v10, %v253_v27  ;;  %961 = vmatprep.subr.bf16.mxu1 %v978_v13  ;;  %v274_v36 = vadd.f32 %v1053_v10, %v254_v28  ;;  %v275_v37 = vadd.f32 %v1053_v10, %v255_v29  ;;  %v910_v62 = vunpack.c.h.bf16 %v920_v49 }
  0x17   : > { %v276_v39 = vadd.f32 %v1053_v10, %v256_v30  ;;  %v286_v40 = vmax.f32 %v270_v32, 0.0  ;;  %v287_v41 = vmax.f32 %v271_v33, 0.0  ;;  %v288_v42 = vmax.f32 %v272_v34, 0.0 }
  0x18   : > { %v289_v43 = vmax.f32 %v273_v35, 0.0  ;;  %v290_v45 = vmax.f32 %v274_v36, 0.0  ;;  %v291_v46 = vmax.f32 %v275_v37, 0.0  ;;  %v277_v47 = vadd.f32 %v1053_v10, %v257_v38 }
  0x19   : > { %941 = vmatpush3.bf16.msra.mxu0 %v978_v13  ;;  %965 = vmatpush3.bf16.msra.mxu1 %v978_v13  ;;  %v292_v48 = vmax.f32 %v276_v39, 0.0  ;;  %v302_v50 = vpack.c.bf16 %v287_v41, %v286_v40  ;;  %v258_v53 = vmul.f32 %v901_v31, %v1050_v8  ;;  %v259_v59 = vmul.f32 %v902_v52, %v1050_v8 }
  0x1a   : > { %v303_v51 = vpack.c.bf16 %v289_v43, %v288_v42  ;;  %v304_v55 = vpack.c.bf16 %v291_v46, %v290_v45  ;;  %v293_v56 = vmax.f32 %v277_v47, 0.0  ;;  %v260_v63 = vmul.f32 %v905_v57, %v1050_v8 }
  0x1b   : > { %942 = vmatprep.mubr.msk.bf16.mxu0 %vm342_vm0, %v302_v50  ;;  %v278_v60 = vadd.f32 %v1053_v10, %v258_v53  ;;  %v261_v0 = vmul.f32 %v906_v58, %v1050_v8  ;;  %v913_v1 = vunpack.c.l.bf16 %v921_v54  ;;  %v279_v2 = vadd.f32 %v1053_v10, %v259_v59 }
  0x1c   : > { %943 = vmatmul.mubr.msk.bf16.vlgmr.msra.gmra.mxu0 %vm342_vm0, %v303_v51  ;;  %v262_v5 = vmul.f32 %v909_v61, %v1050_v8  ;;  %v263_v6 = vmul.f32 %v910_v62, %v1050_v8  ;;  %v280_v7 = vadd.f32 %v1053_v10, %v260_v63  ;;  %v914_v11 = vunpack.c.h.bf16 %v921_v54 }
  0x1d   : > { %946 = vmatprep.mubr.msk.bf16.mxu0 %vm342_vm0, %v304_v55  ;;  %v294_v4 = vmax.f32 %v278_v60, 0.0  ;;  %v281_v9 = vadd.f32 %v1053_v10, %v261_v0  ;;  %v264_v12 = vmul.f32 %v913_v1, %v1050_v8  ;;  %v305_v13 = vpack.c.bf16 %v293_v56, %v292_v48 }
  0x1e   : > { %v295_v14 = vmax.f32 %v279_v2, 0.0  ;;  %v282_v15 = vadd.f32 %v1053_v10, %v262_v5  ;;  %v283_v16 = vadd.f32 %v1053_v10, %v263_v6  ;;  %v296_v17 = vmax.f32 %v280_v7, 0.0 }
  0x1f   : > { %v297_v18 = vmax.f32 %v281_v9, 0.0  ;;  %v265_v19 = vmul.f32 %v914_v11, %v1050_v8  ;;  %v284_v20 = vadd.f32 %v1053_v10, %v264_v12  ;;  %v548_v29 = vadd.s32 16, %v1030_v3 }
  0x20   : > { %v306_v21 = vpack.c.bf16 %v295_v14, %v294_v4  ;;  %v298_v22 = vmax.f32 %v282_v15, 0.0  ;;  %v299_v23 = vmax.f32 %v283_v16, 0.0  ;;  %v1116_v30 = vstv %s864_s11 }
  0x21   : > { %v307_v24 = vpack.c.bf16 %v297_v18, %v296_v17  ;;  %v285_v25 = vadd.f32 %v1053_v10, %v265_v19  ;;  %v300_v27 = vmax.f32 %v284_v20, 0.0  ;;  %v987_v10 = vmov 0.0  }
  0x22   : > { %950 = vmatprep.mubr.msk.bf16.mxu1 %vm342_vm0, %v306_v21  ;;  %v308_v26 = vpack.c.bf16 %v299_v23, %v298_v22  ;;  %645 = vst.msk [vmem:[%s1110_s10] sm:$0xff] %vm644_vm1, %v987_v10  ;;  %v564_v31 = vadd.s32 %v1116_v30, %v1030_v3  ;;  %v549_v32 = vadd.s32 24, %v1030_v3  ;;  %v547_v33 = vadd.s32 8, %v1030_v3 }
  0x23   : > { %951 = vmatmul.mubr.msk.bf16.vlgmr.msra.gmra.mxu1 %vm342_vm0, %v307_v24  ;;  %v301_v8 = vmax.f32 %v285_v25, 0.0  ;;  %v566_v34 = vadd.s32 %v1116_v30, %v548_v29  ;;  %v552_v35 = vadd.s32 48, %v1030_v3  ;;  %v550_v36 = vadd.s32 32, %v1030_v3 }
  0x24   : > { %947 = vmatmul.mubr.msk.bf16.gmra.mxu0 %vm342_vm0, %v305_v13  ;;  %954 = vmatprep.mubr.msk.bf16.mxu1 %vm342_vm0, %v308_v26  ;;  %v553_v37 = vadd.s32 56, %v1030_v3  ;;  %vm580_vm3 = vcmp.lt.s32.totalorder %v564_v31, 288  ;;  %v567_v39 = vadd.s32 %v1116_v30, %v549_v32  ;;  %v565_v40 = vadd.s32 %v1116_v30, %v547_v33 }
  0x25   : > { %v309_v28 = vpack.c.bf16 %v301_v8, %v300_v27  ;;  %vm582_vm4 = vcmp.lt.s32.totalorder %v566_v34, 288  ;;  %v1136_v42 = vadd.s32 %v1116_v30, %v552_v35  ;;  %v568_v43 = vadd.s32 %v1116_v30, %v550_v36 }
  0x26   : > { %v556_v45 = vadd.s32 80, %v1030_v3  ;;  %v551_v46 = vadd.s32 40, %v1030_v3  ;;  %v1144_v49 = vadd.s32 %v1116_v30, %v553_v37  ;;  %vm583_vm5 = vcmp.lt.s32.totalorder %v567_v39, 288 }
  0x27   : > { %vm581_vm6 = vcmp.lt.s32.totalorder %v565_v40, 288  ;;  %v554_v52 = vadd.s32 64, %v1030_v3  ;;  %vm586_vm7 = vcmp.lt.s32.totalorder %v1136_v42, 288  ;;  %vm584_vm8 = vcmp.lt.s32.totalorder %v568_v43, 288 }
  0x28   : > { %v557_v54 = vadd.s32 88, %v1030_v3  ;;  %v1152_v57 = vadd.s32 %v1116_v30, %v556_v45  ;;  %v1155_v58 = vadd.s32 %v1116_v30, %v551_v46  ;;  %v555_v59 = vadd.s32 72, %v1030_v3 }
  0x29   : > { %vm587_vm9 = vcmp.lt.s32.totalorder %v1144_v49, 288  ;;  %v1167_v6 = vadd.s32 %v1116_v30, %v554_v52  ;;  %v560_v35 = vadd.s32 112, %v1030_v3  ;;  %v558_v43 = vadd.s32 96, %v1030_v3 }
  0x2a   : > { %v1174_v12 = vadd.s32 %v1116_v30, %v557_v54  ;;  %v573_v22 = vadd.s32 %v1116_v30, %v555_v59  ;;  %vm590_vm10 = vcmp.lt.s32.totalorder %v1152_v57, 288  ;;  %vm585_vm12 = vcmp.lt.s32.totalorder %v1155_v58, 288 }
  0x2b   : > { %955 = vmatmul.mubr.msk.bf16.gmra.mxu1 %vm342_vm0, %v309_v28  ;;  %vm588_vm11 = vcmp.lt.s32.totalorder %v1167_v6, 288  ;;  %v561_v46 = vadd.s32 120, %v1030_v3  ;;  %v576_v58 = vadd.s32 %v1116_v30, %v558_v43 }
  0x2c   : > { %vm591_vm13 = vcmp.lt.s32.totalorder %v1174_v12, 288  ;;  %vm589_vm14 = vcmp.lt.s32.totalorder %v573_v22, 288 }
  0x2d   : > { %vm592_vm15 = vcmp.lt.s32.totalorder %v576_v58, 288  ;;  %v579_v57 = vadd.s32 %v1116_v30, %v561_v46 }
  0xdc   : > { %v944_v38 = vpop.f32.mrf.mxu0 }
  0xdd   : > { %v869_v41 = vpack.c.bf16 %v944_v38, %v944_v38  ;;  %v630_v50 = vsel %vm582_vm4, %v944_v38, 0.0  ;;  %vm683_vm4 = vcmask 253952  }
  0xde   : > { %v401_v44 = vpop.f32.mrf.mxu0  ;;  %v687_v60 = vmul.f32 %v944_v38, %v630_v50  ;;  %v649_v13 = vsel %vm644_vm1, %v630_v50, 0.0 }
  0xdf   : > { %531 = vst.msk [vmem:[%s1131_s14 + $0x8] sm:$0xf] %vm528_vm2, %v869_v41  ;;  %v867_v47 = vpack.c.bf16 %v401_v44, %v401_v44  ;;  %v628_v48 = vsel %vm580_vm3, %v401_v44, 0.0 }
  0xe0   : > { %v945_v51 = vpop.f32.mrf.mxu0  ;;  %v685_v55 = vmul.f32 %v628_v48, %v401_v44  ;;  %v646_v0 = vsel %vm644_vm1, %v628_v48, 0.0  ;;  %v704_v19 = vsel %vm644_vm1, %v687_v60, 0.0 }
  0xe1   : > { %529 = vst.msk [vmem:[%s1131_s14] sm:$0xf] %vm528_vm2, %v867_v47  ;;  %v870_v53 = vpack.c.bf16 %v945_v51, %v945_v51  ;;  %v631_v61 = vsel %vm583_vm5, %v945_v51, 0.0  ;;  %v559_v47 = vadd.s32 104, %v1030_v3 }
  0xe2   : > { %v404_v56 = vpop.f32.mrf.mxu0  ;;  %v701_v14 = vsel %vm644_vm1, %v685_v55, 0.0  ;;  %v688_v15 = vmul.f32 %v945_v51, %v631_v61  ;;  %v651_v23 = vsel %vm644_vm1, %v631_v61, 0.0  ;;  %v578_v51 = vadd.s32 %v1116_v30, %v560_v35 }
  0xe3   : > { %532 = vst.msk [vmem:[%s1131_s14 + $0xc] sm:$0xf] %vm528_vm2, %v870_v53  ;;  %v868_v62 = vpack.c.bf16 %v404_v56, %v404_v56  ;;  %v629_v63 = vsel %vm581_vm6, %v404_v56, 0.0  ;;  %v1164_v5 = vpop.f32.mrf.mxu1 }
  0xe4   : > { %v647_v1 = vsel %vm644_vm1, %v629_v63, 0.0  ;;  %v686_v2 = vmul.f32 %v629_v63, %v404_v56  ;;  %v948_v4 = vpop.f32.mrf.mxu0  ;;  %v877_v11 = vpack.c.bf16 %v1164_v5, %v1164_v5  ;;  %v706_v29 = vsel %vm644_vm1, %v688_v15, 0.0 }
  0xe5   : > { %530 = vst.msk [vmem:[%s1131_s14 + $0x4] sm:$0xf] %vm528_vm2, %v868_v62  ;;  %v648_v7 = vadd.f32 %v647_v1, %v646_v0  ;;  %v873_v9 = vpack.c.bf16 %v948_v4, %v948_v4  ;;  %v1179_v18 = vpop.f32.mrf.mxu1  ;;  %v634_v38 = vsel %vm586_vm7, %v948_v4, 0.0  ;;  %v638_v15 = vsel %vm590_vm10, %v1164_v5, 0.0 }
  0xe6   : > { %v702_v16 = vsel %vm644_vm1, %v686_v2, 0.0  ;;  %v417_v17 = vpop.f32.mrf.mxu0  ;;  %539 = vst.msk [vmem:[%s1131_s14 + $0x28] sm:$0xf] %vm528_vm2, %v877_v11  ;;  %v875_v26 = vpack.c.bf16 %v1179_v18, %v1179_v18  ;;  %v691_v53 = vmul.f32 %v948_v4, %v634_v38  ;;  %v657_v56 = vsel %vm644_vm1, %v634_v38, 0.0 }
  0xe7   : > { %v650_v20 = vadd.f32 %v649_v13, %v648_v7  ;;  %v703_v21 = vadd.f32 %v702_v16, %v701_v14  ;;  %535 = vst.msk [vmem:[%s1131_s14 + $0x18] sm:$0xf] %vm528_vm2, %v873_v9  ;;  %v871_v24 = vpack.c.bf16 %v417_v17, %v417_v17  ;;  %v632_v25 = vsel %vm584_vm8, %v417_v17, 0.0  ;;  %v1191_v8 = vpop.f32.mrf.mxu1 }
  0xe8   : > { %v949_v27 = vpop.f32.mrf.mxu0  ;;  %v689_v31 = vmul.f32 %v632_v25, %v417_v17  ;;  %537 = vst.msk [vmem:[%s1131_s14 + $0x20] sm:$0xf] %vm528_vm2, %v875_v26  ;;  %v653_v36 = vsel %vm644_vm1, %v632_v25, 0.0  ;;  %v878_v40 = vpack.c.bf16 %v1191_v8, %v1191_v8  ;;  %v636_v49 = vsel %vm588_vm11, %v1179_v18, 0.0 }
  0xe9   : > { %v705_v28 = vadd.f32 %v704_v19, %v703_v21  ;;  %v652_v10 = vadd.f32 %v651_v23, %v650_v20  ;;  %533 = vst.msk [vmem:[%s1131_s14 + $0x10] sm:$0xf] %vm528_vm2, %v871_v24  ;;  %v874_v32 = vpack.c.bf16 %v949_v27, %v949_v27  ;;  %v436_v34 = vpop.f32.mrf.mxu1  ;;  %v635_v48 = vsel %vm587_vm9, %v949_v27, 0.0 }
  0xea   : > { %v420_v33 = vpop.f32.mrf.mxu0  ;;  %v708_v44 = vsel %vm644_vm1, %v689_v31, 0.0  ;;  %540 = vst.msk [vmem:[%s1131_s14 + $0x2c] sm:$0xf] %vm528_vm2, %v878_v40  ;;  %v876_v3 = vpack.c.bf16 %v436_v34, %v436_v34  ;;  %v692_v61 = vmul.f32 %v949_v27, %v635_v48  ;;  %v637_v4 = vsel %vm589_vm14, %v436_v34, 0.0 }
  0xeb   : > { %v707_v37 = vadd.f32 %v706_v29, %v705_v28  ;;  %v654_v39 = vadd.f32 %v653_v36, %v652_v10  ;;  %536 = vst.msk [vmem:[%s1131_s14 + $0x1c] sm:$0xf] %vm528_vm2, %v874_v32  ;;  %v1210_v41 = vpop.f32.mrf.mxu1  ;;  %v872_v45 = vpack.c.bf16 %v420_v33, %v420_v33  ;;  %v633_v50 = vsel %vm585_vm12, %v420_v33, 0.0 }
  0xec   : > { %v655_v54 = vsel %vm644_vm1, %v633_v50, 0.0  ;;  %v690_v55 = vmul.f32 %v633_v50, %v420_v33  ;;  %538 = vst.msk [vmem:[%s1131_s14 + $0x24] sm:$0xf] %vm528_vm2, %v876_v3  ;;  %v881_v63 = vpack.c.bf16 %v1210_v41, %v1210_v41  ;;  %v577_v7 = vadd.s32 %v1116_v30, %v559_v47 }
  0xed   : > { %v709_v42 = vadd.f32 %v708_v44, %v707_v37  ;;  %v449_v52 = vpop.f32.mrf.mxu1  ;;  %534 = vst.msk [vmem:[%s1131_s14 + $0x14] sm:$0xf] %vm528_vm2, %v872_v45  ;;  %v656_v59 = vadd.f32 %v655_v54, %v654_v39  ;;  %v712_v9 = vsel %vm644_vm1, %v691_v53, 0.0  ;;  %v693_v11 = vmul.f32 %v636_v49, %v1179_v18 }
  0xee   : > { %v710_v62 = vsel %vm644_vm1, %v690_v55, 0.0  ;;  %v879_v0 = vpack.c.bf16 %v449_v52, %v449_v52  ;;  %v659_v13 = vsel %vm644_vm1, %v635_v48, 0.0  ;;  %543 = vst.msk [vmem:[%s1131_s14 + $0x38] sm:$0xf] %vm528_vm2, %v881_v63  ;;  %v661_v19 = vsel %vm644_vm1, %v636_v49, 0.0 }
  0xef   : > { %v1231_v60 = vpop.f32.mrf.mxu1  ;;  %v658_v1 = vadd.f32 %v657_v56, %v656_v59  ;;  %v711_v2 = vadd.f32 %v710_v62, %v709_v42  ;;  %v714_v18 = vsel %vm644_vm1, %v692_v61, 0.0  ;;  %v694_v20 = vmul.f32 %v637_v4, %v436_v34 }
  0xf0   : > { %541 = vst.msk [vmem:[%s1131_s14 + $0x30] sm:$0xf] %vm528_vm2, %v879_v0  ;;  %v882_v14 = vpack.c.bf16 %v1231_v60, %v1231_v60  ;;  %v639_v22 = vsel %vm591_vm13, %v1191_v8, 0.0  ;;  %v695_v25 = vmul.f32 %v1164_v5, %v638_v15  ;;  %v716_v26 = vsel %vm644_vm1, %v693_v11, 0.0 }
  0xf1   : > { %v452_v6 = vpop.f32.mrf.mxu1  ;;  %v660_v16 = vadd.f32 %v659_v13, %v658_v1  ;;  %v713_v17 = vadd.f32 %v712_v9, %v711_v2  ;;  %v663_v27 = vsel %vm644_vm1, %v637_v4, 0.0  ;;  %vm593_vm0 = vcmp.lt.s32.totalorder %v577_v7, 288 }
  0xf2   : > { %544 = vst.msk [vmem:[%s1131_s14 + $0x3c] sm:$0xf] %vm528_vm2, %v882_v14  ;;  %v880_v21 = vpack.c.bf16 %v452_v6, %v452_v6  ;;  %v640_v29 = vsel %vm592_vm15, %v449_v52, 0.0  ;;  %v665_v12 = vsel %vm644_vm1, %v638_v15, 0.0  ;;  %v696_v31 = vmul.f32 %v1191_v8, %v639_v22 }
  0xf3   : > { %v715_v23 = vadd.f32 %v714_v18, %v713_v17  ;;  %v662_v24 = vadd.f32 %v661_v19, %v660_v16  ;;  %v718_v32 = vsel %vm644_vm1, %v694_v20, 0.0  ;;  %vm594_vm3 = vcmp.lt.s32.totalorder %v578_v51, 288 }
  0xf4   : > { %542 = vst.msk [vmem:[%s1131_s14 + $0x34] sm:$0xf] %vm528_vm2, %v880_v21  ;;  %v641_v33 = vsel %vm593_vm0, %v452_v6, 0.0  ;;  %v720_v34 = vsel %vm644_vm1, %v695_v25, 0.0  ;;  %v667_v35 = vsel %vm644_vm1, %v639_v22, 0.0  ;;  %v697_v36 = vmul.f32 %v640_v29, %v449_v52 }
  0xf5   : > { %v664_v28 = vadd.f32 %v663_v27, %v662_v24  ;;  %v717_v10 = vadd.f32 %v716_v26, %v715_v23  ;;  %vm595_vm2 = vcmp.lt.s32.totalorder %v579_v57, 288  ;;  %v642_v38 = vsel %vm594_vm3, %v1210_v41, 0.0 }
  0xf6   : > { %v722_v40 = vsel %vm644_vm1, %v696_v31, 0.0  ;;  %v669_v8 = vsel %vm644_vm1, %v640_v29, 0.0  ;;  %v698_v43 = vmul.f32 %v641_v33, %v452_v6  ;;  %v643_v46 = vsel %vm595_vm2, %v1231_v60, 0.0 }
  0xf7   : > { %v666_v30 = vadd.f32 %v665_v12, %v664_v28  ;;  %v719_v5 = vadd.f32 %v718_v32, %v717_v10  ;;  %v699_v47 = vmul.f32 %v1210_v41, %v642_v38  ;;  %v724_v42 = vsel %vm644_vm1, %v697_v36, 0.0 }
  0xf8   : > { %v671_v48 = vsel %vm644_vm1, %v641_v33, 0.0  ;;  %v673_v52 = vsel %vm644_vm1, %v642_v38, 0.0  ;;  %v700_v53 = vmul.f32 %v1231_v60, %v643_v46  ;;  %v726_v54 = vsel %vm644_vm1, %v698_v43, 0.0 }
  0xf9   : > { %v721_v37 = vadd.f32 %v720_v34, %v719_v5  ;;  %v668_v39 = vadd.f32 %v667_v35, %v666_v30  ;;  %v728_v56 = vsel %vm644_vm1, %v699_v47, 0.0  ;;  %v675_v49 = vsel %vm644_vm1, %v643_v46, 0.0 }
  0xfa   : > { %v730_v58 = vsel %vm644_vm1, %v700_v53, 0.0 }
  0xfb   : > { %v670_v44 = vadd.f32 %v669_v8, %v668_v39  ;;  %v723_v45 = vadd.f32 %v722_v40, %v721_v37 }
  0xfd   : > { %v725_v50 = vadd.f32 %v724_v42, %v723_v45  ;;  %v672_v51 = vadd.f32 %v671_v48, %v670_v44 }
  0xff   : > { %v674_v55 = vadd.f32 %v673_v52, %v672_v51  ;;  %v727_v3 = vadd.f32 %v726_v54, %v725_v50 }
 0x101   : > { %v676_v59 = vadd.f32 %v675_v49, %v674_v55  ;;  %v729_v41 = vadd.f32 %v728_v56, %v727_v3 }
 0x103   : > { %v677_v61 = vrot.slane %v676_v59, 4  ;;  %v731_v62 = vadd.f32 %v730_v58, %v729_v41 }
 0x105   : > { %v678_v63 = vadd.f32 %v677_v61, %v676_v59  ;;  %v732_v0 = vrot.slane %v731_v62, 4 }
 0x107   : > { %v679_v1 = vrot.slane %v678_v63, 2  ;;  %v733_v60 = vadd.f32 %v732_v0, %v731_v62 }
 0x109   : > { %v680_v2 = vadd.f32 %v679_v1, %v678_v63  ;;  %v734_v4 = vrot.slane %v733_v60, 2 }
 0x10b   : > { %v681_v6 = vrot.slane %v680_v2, 1  ;;  %v735_v7 = vadd.f32 %v734_v4, %v733_v60 }
 0x10d   : > { %v682_v9 = vadd.f32 %v681_v6, %v680_v2  ;;  %v736_v11 = vrot.slane %v735_v7, 1 }
 0x10f   : > { %684 = vst.msk [vmem:[%s1110_s10] sm:$0x1] %vm683_vm4, %v682_v9  ;;  %v737_v13 = vadd.f32 %v736_v11, %v735_v7 }
 0x111   : > { %738 = vst.msk [vmem:[%s1110_s10 + $0x1] sm:$0x1] %vm683_vm4, %v737_v13 }
 0x112 PF: > { %s15_s15 = sadd.s32 1, %s985_s15  }
 0x113   : > { %p12_p5 = scmp.ge.s32.totalorder %s15_s15, 5  }
 0x115   :  { %14 = sbr.rel (!%p12_p5) target bundleno = 1 (0x1), region = 74 }

// kernel: generator_forward.8
= control target key start
LH: loop header
LB: loop body
LE: loop exit
PB: predicated region body
PF: predicated region fallthrough
CT: control target
= control target key end

     0   :  { %s983_s15 = smov 0   ;;  %s1253_s0 = inlined_call_operand.vmem [shape: bf16[384,32], index: 0, kind: input, shape index: {}]   ;;  %s1254_s1 = inlined_call_operand.vmem [shape: f32[2,32], index: 1, kind: input, shape index: {}]   ;;  %s1255_s2 = inlined_call_operand.vmem [shape: bf16[32,64], index: 2, kind: input, shape index: {}]   ;;  %s1256_s3 = inlined_call_operand.vmem [shape: bf16[384,64], index: 3, kind: output, shape index: {0}]   ;;  %s1257_s4 = inlined_call_operand.vmem [shape: f32[24,64], index: 4, kind: output, shape index: {1}]  }
   0x1 LB: > { %s989_s16 = sadd.s32 4294967295, %s955_s15   ;;  %p814_p0 = scmp.ge.s32.totalorder %s955_s15, 1  ;;  %s955_s15 = sphi %s983_s15, %s15_s15  }
   0x2   : > { %p166_p1 = scmp.lt.s32.totalorder %s955_s15, 4 }
   0x4   : > { %p167_p2 = pnand %p814_p0, %p166_p1 }
   0x5   : > { %s815_s19 = sshll.u32 (!%p167_p2), %s989_s16, 4  ;;  %p208_p4 = scmp.lt.s32.totalorder (!%p167_p2), %s989_s16, 2 }
   0x6   : > { %170 = sbr.rel (%p167_p2) target bundleno = 274 (0x112), region = 32  ;;  %p197_p3 = scmp.lt.s32.totalorder (!%p167_p2), %s815_s19, 47 }
   0x7   : > { %s846_s7 = sshll.u32 (!%p167_p2), %s989_s16, 7 }
   0xb   : > { %v947_v0 = vld [vmem:[%s1255_s2 + $0x8] sm:$0xff]   ;;  %v246_v1 = vlaneseq  ;;  %v948_v2 = vld [vmem:[%s1255_s2] sm:$0xff]   ;;  %s1259_s19 = smov (!%p197_p3, %s815_s19), 47  ;;  %vm326_vm0 = vcmask 261120   ;;  %vm628_vm1 = vcmask 523264   ;;  %vm512_vm2 = vcmask 519168  }
   0xc   : > { %914 = vmatprep.subr.bf16.mxu0 %v947_v0  ;;  %934 = vmatprep.subr.bf16.mxu1 %v947_v0  ;;  %v245_v4 = vld [vmem:[%s1254_s1] sm:$0x3]  ;;  %s816_s24 = sshll.u32 %s1259_s19, 2 }
   0xd   : > { %v1000_v3 = vshrl.u32 %v246_v1, 7  ;;  %915 = vmatpush3.bf16.msra.mxu0 %v947_v0  ;;  %936 = vmatpush3.bf16.msra.mxu1 %v947_v0  ;;  %s1015_s27 = scalar_lea.vmem %s1253_s0, %s816_s24  ;;  %s1095_s10 = scalar_lea.vmem %s1256_s3, %s816_s24 }
   0xe   : > { %916 = vmatprep.subr.bf16.mxu0 %v948_v2  ;;  %935 = vmatprep.subr.bf16.mxu1 %v948_v2  ;;  %v866_v8 = vld [vmem:[%s1015_s27] sm:$0xff]   ;;  %v897_v10 = vld [vmem:[%s1015_s27 + $0x8] sm:$0xff]   ;;  %v898_v11 = vld [vmem:[%s1015_s27 + $0x10] sm:$0xff]   ;;  %s209_s28 = scalar_select %p208_p4, %s989_s16, 2 }
   0xf   : > { %v248_v5 = vsub.s32 0, %v1000_v3  ;;  %v268_v6 = vsub.s32 1, %v1000_v3  ;;  %v867_v12 = vunpack.c.l.bf16 %v866_v8  ;;  %v868_v13 = vunpack.c.h.bf16 %v866_v8  ;;  %v899_v16 = vld [vmem:[%s1015_s27 + $0x18] sm:$0xff]   ;;  %v900_v37 = vld [vmem:[%s1015_s27 + $0x20] sm:$0xff]   ;;  %v901_v42 = vld [vmem:[%s1015_s27 + $0x28] sm:$0xff]  }
  0x10   : > { %v871_v14 = vunpack.c.l.bf16 %v897_v10  ;;  %v872_v15 = vunpack.c.h.bf16 %v897_v10  ;;  %v875_v17 = vunpack.c.l.bf16 %v898_v11  ;;  %v876_v18 = vunpack.c.h.bf16 %v898_v11  ;;  %v902_v47 = vld [vmem:[%s1015_s27 + $0x30] sm:$0xff]   ;;  %v903_v52 = vld [vmem:[%s1015_s27 + $0x38] sm:$0xff]   ;;  %s819_s29 = sshll.u32 %s209_s28, 3 }
  0x11   : > { %v1017_v7 = vrot.slane %v245_v4, %v248_v5  ;;  %917 = vmatpush3.bf16.msra.mxu0 %v948_v2  ;;  %v1020_v9 = vrot.slane %v245_v4, %v268_v6  ;;  %937 = vmatpush3.bf16.msra.mxu1 %v948_v2  ;;  %v879_v19 = vunpack.c.l.bf16 %v899_v16  ;;  %v880_v20 = vunpack.c.h.bf16 %v899_v16  ;;  %s1074_s6 = scalar_lea.vmem %s1257_s4, %s819_s29 }
  0x12   : > { %v883_v50 = vunpack.c.l.bf16 %v900_v37  ;;  %v884_v51 = vunpack.c.h.bf16 %v900_v37  ;;  %v887_v55 = vunpack.c.l.bf16 %v901_v42  ;;  %v888_v56 = vunpack.c.h.bf16 %v901_v42 }
  0x13   : > { %v250_v21 = vmul.f32 %v867_v12, %v1017_v7  ;;  %v251_v22 = vmul.f32 %v868_v13, %v1017_v7  ;;  %v252_v23 = vmul.f32 %v871_v14, %v1017_v7  ;;  %v253_v24 = vmul.f32 %v872_v15, %v1017_v7 }
  0x14   : > { %v254_v25 = vmul.f32 %v875_v17, %v1017_v7  ;;  %v255_v26 = vmul.f32 %v876_v18, %v1017_v7  ;;  %v256_v27 = vmul.f32 %v879_v19, %v1017_v7  ;;  %v257_v28 = vmul.f32 %v880_v20, %v1017_v7 }
  0x15   : > { %v270_v29 = vadd.f32 %v1020_v9, %v250_v21  ;;  %v271_v30 = vadd.f32 %v1020_v9, %v251_v22  ;;  %v272_v31 = vadd.f32 %v1020_v9, %v252_v23  ;;  %v273_v32 = vadd.f32 %v1020_v9, %v253_v24 }
  0x16   : > { %v274_v33 = vadd.f32 %v1020_v9, %v254_v25  ;;  %v275_v34 = vadd.f32 %v1020_v9, %v255_v26  ;;  %v276_v35 = vadd.f32 %v1020_v9, %v256_v27  ;;  %v277_v36 = vadd.f32 %v1020_v9, %v257_v28 }
  0x17   : > { %v286_v38 = vmax.f32 %v270_v29, 0.0  ;;  %v287_v39 = vmax.f32 %v271_v30, 0.0  ;;  %v288_v40 = vmax.f32 %v272_v31, 0.0  ;;  %v289_v41 = vmax.f32 %v273_v32, 0.0 }
  0x18   : > { %v290_v43 = vmax.f32 %v274_v33, 0.0  ;;  %v291_v44 = vmax.f32 %v275_v34, 0.0  ;;  %v292_v45 = vmax.f32 %v276_v35, 0.0  ;;  %v293_v46 = vmax.f32 %v277_v36, 0.0 }
  0x19   : > { %v302_v48 = vpack.c.bf16 %v287_v39, %v286_v38  ;;  %v303_v49 = vpack.c.bf16 %v289_v41, %v288_v40  ;;  %v258_v57 = vmul.f32 %v883_v50, %v1017_v7  ;;  %v259_v58 = vmul.f32 %v884_v51, %v1017_v7 }
  0x1a   : > { %v304_v53 = vpack.c.bf16 %v291_v44, %v290_v43  ;;  %v305_v54 = vpack.c.bf16 %v293_v46, %v292_v45  ;;  %v891_v59 = vunpack.c.l.bf16 %v902_v47  ;;  %v892_v60 = vunpack.c.h.bf16 %v902_v47 }
  0x1b   : > { %918 = vmatprep.mubr.msk.bf16.mxu0 %vm326_vm0, %v302_v48  ;;  %v260_v61 = vmul.f32 %v887_v55, %v1017_v7  ;;  %v261_v62 = vmul.f32 %v888_v56, %v1017_v7  ;;  %v895_v63 = vunpack.c.l.bf16 %v903_v52  ;;  %v896_v0 = vunpack.c.h.bf16 %v903_v52 }
  0x1c   : > { %919 = vmatmul.mubr.msk.bf16.vlgmr.msra.gmra.mxu0 %vm326_vm0, %v303_v49  ;;  %v278_v1 = vadd.f32 %v1020_v9, %v258_v57  ;;  %v279_v2 = vadd.f32 %v1020_v9, %v259_v58  ;;  %v262_v4 = vmul.f32 %v891_v59, %v1017_v7  ;;  %v263_v5 = vmul.f32 %v892_v60, %v1017_v7 }
  0x1d   : > { %922 = vmatprep.mubr.msk.bf16.mxu0 %vm326_vm0, %v304_v53  ;;  %v280_v6 = vadd.f32 %v1020_v9, %v260_v61  ;;  %v281_v8 = vadd.f32 %v1020_v9, %v261_v62  ;;  %v264_v10 = vmul.f32 %v895_v63, %v1017_v7  ;;  %v265_v11 = vmul.f32 %v896_v0, %v1017_v7 }
  0x1e   : > { %v294_v12 = vmax.f32 %v278_v1, 0.0  ;;  %v295_v13 = vmax.f32 %v279_v2, 0.0  ;;  %v282_v14 = vadd.f32 %v1020_v9, %v262_v4  ;;  %v283_v15 = vadd.f32 %v1020_v9, %v263_v5 }
  0x1f   : > { %v296_v16 = vmax.f32 %v280_v6, 0.0  ;;  %v297_v17 = vmax.f32 %v281_v8, 0.0  ;;  %v284_v18 = vadd.f32 %v1020_v9, %v264_v10  ;;  %v285_v19 = vadd.f32 %v1020_v9, %v265_v11 }
  0x20   : > { %v306_v20 = vpack.c.bf16 %v295_v13, %v294_v12  ;;  %v298_v21 = vmax.f32 %v282_v14, 0.0  ;;  %v299_v22 = vmax.f32 %v283_v15, 0.0  ;;  %v957_v9 = vmov 0.0  }
  0x21   : > { %v307_v23 = vpack.c.bf16 %v297_v17, %v296_v16  ;;  %v300_v24 = vmax.f32 %v284_v18, 0.0  ;;  %v301_v25 = vmax.f32 %v285_v19, 0.0  ;;  %629 = vst.msk [vmem:[%s1074_s6] sm:$0xff] %vm628_vm1, %v957_v9  ;;  %v532_v27 = vadd.s32 16, %v1000_v3 }
  0x22   : > { %926 = vmatprep.mubr.msk.bf16.mxu1 %vm326_vm0, %v306_v20  ;;  %v308_v7 = vpack.c.bf16 %v299_v22, %v298_v21  ;;  %v1080_v28 = vstv %s846_s7  ;;  %v533_v30 = vadd.s32 24, %v1000_v3  ;;  %v531_v31 = vadd.s32 8, %v1000_v3 }
  0x23   : > { %927 = vmatmul.mubr.msk.bf16.vlgmr.msra.gmra.mxu1 %vm326_vm0, %v307_v23  ;;  %v309_v26 = vpack.c.bf16 %v301_v25, %v300_v24  ;;  %v548_v29 = vadd.s32 %v1080_v28, %v1000_v3  ;;  %v550_v32 = vadd.s32 %v1080_v28, %v532_v27  ;;  %v536_v33 = vadd.s32 48, %v1000_v3 }
  0x24   : > { %923 = vmatmul.mubr.msk.bf16.gmra.mxu0 %vm326_vm0, %v305_v54  ;;  %930 = vmatprep.mubr.msk.bf16.mxu1 %vm326_vm0, %v308_v7  ;;  %v534_v34 = vadd.s32 32, %v1000_v3  ;;  %v537_v35 = vadd.s32 56, %v1000_v3  ;;  %v551_v37 = vadd.s32 %v1080_v28, %v533_v30  ;;  %v549_v38 = vadd.s32 %v1080_v28, %v531_v31 }
  0x25   : > { %vm564_vm3 = vcmp.lt.s32.totalorder %v548_v29, 288  ;;  %vm566_vm4 = vcmp.lt.s32.totalorder %v550_v32, 288  ;;  %v1100_v40 = vadd.s32 %v1080_v28, %v536_v33  ;;  %v540_v43 = vadd.s32 80, %v1000_v3 }
  0x26   : > { %v552_v41 = vadd.s32 %v1080_v28, %v534_v34  ;;  %v535_v44 = vadd.s32 40, %v1000_v3  ;;  %v1108_v47 = vadd.s32 %v1080_v28, %v537_v35  ;;  %vm567_vm5 = vcmp.lt.s32.totalorder %v551_v37, 288 }
  0x27   : > { %vm565_vm6 = vcmp.lt.s32.totalorder %v549_v38, 288  ;;  %v538_v50 = vadd.s32 64, %v1000_v3  ;;  %vm570_vm7 = vcmp.lt.s32.totalorder %v1100_v40, 288  ;;  %v541_v52 = vadd.s32 88, %v1000_v3 }
  0x28   : > { %vm568_vm8 = vcmp.lt.s32.totalorder %v552_v41, 288  ;;  %v1116_v55 = vadd.s32 %v1080_v28, %v540_v43  ;;  %v1119_v56 = vadd.s32 %v1080_v28, %v535_v44  ;;  %v539_v57 = vadd.s32 72, %v1000_v3 }
  0x29   : > { %vm571_vm9 = vcmp.lt.s32.totalorder %v1108_v47, 288  ;;  %v1131_v4 = vadd.s32 %v1080_v28, %v538_v50  ;;  %v1138_v10 = vadd.s32 %v1080_v28, %v541_v52  ;;  %v544_v33 = vadd.s32 112, %v1000_v3 }
  0x2a   : > { %v557_v20 = vadd.s32 %v1080_v28, %v539_v57  ;;  %vm574_vm10 = vcmp.lt.s32.totalorder %v1116_v55, 288  ;;  %vm569_vm12 = vcmp.lt.s32.totalorder %v1119_v56, 288  ;;  %v542_v41 = vadd.s32 96, %v1000_v3 }
  0x2b   : > { %931 = vmatmul.mubr.msk.bf16.gmra.mxu1 %vm326_vm0, %v309_v26  ;;  %vm572_vm11 = vcmp.lt.s32.totalorder %v1131_v4, 288  ;;  %vm575_vm13 = vcmp.lt.s32.totalorder %v1138_v10, 288  ;;  %v545_v44 = vadd.s32 120, %v1000_v3 }
  0x2c   : > { %vm573_vm14 = vcmp.lt.s32.totalorder %v557_v20, 288  ;;  %v560_v56 = vadd.s32 %v1080_v28, %v542_v41 }
  0x2d   : > { %v563_v55 = vadd.s32 %v1080_v28, %v545_v44 }
  0x2e   : > { %vm576_vm15 = vcmp.lt.s32.totalorder %v560_v56, 288 }
  0xdc   : > { %v920_v36 = vpop.f32.mrf.mxu0 }
  0xdd   : > { %v851_v39 = vpack.c.bf16 %v920_v36, %v920_v36  ;;  %v614_v48 = vsel %vm566_vm4, %v920_v36, 0.0  ;;  %vm667_vm4 = vcmask 516096  }
  0xde   : > { %v385_v42 = vpop.f32.mrf.mxu0  ;;  %v671_v58 = vmul.f32 %v920_v36, %v614_v48  ;;  %v633_v11 = vsel %vm628_vm1, %v614_v48, 0.0 }
  0xdf   : > { %515 = vst.msk [vmem:[%s1095_s10 + $0x8] sm:$0xf] %vm512_vm2, %v851_v39  ;;  %v849_v45 = vpack.c.bf16 %v385_v42, %v385_v42  ;;  %v612_v46 = vsel %vm564_vm3, %v385_v42, 0.0 }
  0xe0   : > { %v921_v49 = vpop.f32.mrf.mxu0  ;;  %v669_v53 = vmul.f32 %v612_v46, %v385_v42  ;;  %v630_v62 = vsel %vm628_vm1, %v612_v46, 0.0  ;;  %v688_v17 = vsel %vm628_vm1, %v671_v58, 0.0 }
  0xe1   : > { %513 = vst.msk [vmem:[%s1095_s10] sm:$0xf] %vm512_vm2, %v849_v45  ;;  %v852_v51 = vpack.c.bf16 %v921_v49, %v921_v49  ;;  %v615_v59 = vsel %vm567_vm5, %v921_v49, 0.0  ;;  %v543_v45 = vadd.s32 104, %v1000_v3 }
  0xe2   : > { %v388_v54 = vpop.f32.mrf.mxu0  ;;  %v685_v12 = vsel %vm628_vm1, %v669_v53, 0.0  ;;  %v672_v13 = vmul.f32 %v921_v49, %v615_v59  ;;  %v635_v21 = vsel %vm628_vm1, %v615_v59, 0.0  ;;  %v562_v49 = vadd.s32 %v1080_v28, %v544_v33 }
  0xe3   : > { %516 = vst.msk [vmem:[%s1095_s10 + $0xc] sm:$0xf] %vm512_vm2, %v852_v51  ;;  %v850_v60 = vpack.c.bf16 %v388_v54, %v388_v54  ;;  %v613_v61 = vsel %vm565_vm6, %v388_v54, 0.0  ;;  %v1128_v2 = vpop.f32.mrf.mxu1 }
  0xe4   : > { %v631_v63 = vsel %vm628_vm1, %v613_v61, 0.0  ;;  %v670_v0 = vmul.f32 %v613_v61, %v388_v54  ;;  %v924_v1 = vpop.f32.mrf.mxu0  ;;  %v859_v8 = vpack.c.bf16 %v1128_v2, %v1128_v2  ;;  %v690_v27 = vsel %vm628_vm1, %v672_v13, 0.0 }
  0xe5   : > { %514 = vst.msk [vmem:[%s1095_s10 + $0x4] sm:$0xf] %vm512_vm2, %v850_v60  ;;  %v632_v5 = vadd.f32 %v631_v63, %v630_v62  ;;  %v855_v6 = vpack.c.bf16 %v924_v1, %v924_v1  ;;  %v1143_v16 = vpop.f32.mrf.mxu1  ;;  %v618_v36 = vsel %vm570_vm7, %v924_v1, 0.0  ;;  %v622_v13 = vsel %vm574_vm10, %v1128_v2, 0.0 }
  0xe6   : > { %v686_v14 = vsel %vm628_vm1, %v670_v0, 0.0  ;;  %v401_v15 = vpop.f32.mrf.mxu0  ;;  %523 = vst.msk [vmem:[%s1095_s10 + $0x28] sm:$0xf] %vm512_vm2, %v859_v8  ;;  %v857_v7 = vpack.c.bf16 %v1143_v16, %v1143_v16  ;;  %v675_v51 = vmul.f32 %v924_v1, %v618_v36  ;;  %v641_v54 = vsel %vm628_vm1, %v618_v36, 0.0 }
  0xe7   : > { %v634_v18 = vadd.f32 %v633_v11, %v632_v5  ;;  %v687_v19 = vadd.f32 %v686_v14, %v685_v12  ;;  %519 = vst.msk [vmem:[%s1095_s10 + $0x18] sm:$0xf] %vm512_vm2, %v855_v6  ;;  %v853_v22 = vpack.c.bf16 %v401_v15, %v401_v15  ;;  %v616_v23 = vsel %vm568_vm8, %v401_v15, 0.0  ;;  %v1155_v25 = vpop.f32.mrf.mxu1 }
  0xe8   : > { %v925_v24 = vpop.f32.mrf.mxu0  ;;  %v673_v29 = vmul.f32 %v616_v23, %v401_v15  ;;  %521 = vst.msk [vmem:[%s1095_s10 + $0x20] sm:$0xf] %vm512_vm2, %v857_v7  ;;  %v637_v34 = vsel %vm628_vm1, %v616_v23, 0.0  ;;  %v860_v38 = vpack.c.bf16 %v1155_v25, %v1155_v25  ;;  %v620_v47 = vsel %vm572_vm11, %v1143_v16, 0.0 }
  0xe9   : > { %v689_v26 = vadd.f32 %v688_v17, %v687_v19  ;;  %v636_v9 = vadd.f32 %v635_v21, %v634_v18  ;;  %517 = vst.msk [vmem:[%s1095_s10 + $0x10] sm:$0xf] %vm512_vm2, %v853_v22  ;;  %v856_v30 = vpack.c.bf16 %v925_v24, %v925_v24  ;;  %v420_v32 = vpop.f32.mrf.mxu1  ;;  %v619_v46 = vsel %vm571_vm9, %v925_v24, 0.0 }
  0xea   : > { %v404_v31 = vpop.f32.mrf.mxu0  ;;  %v692_v42 = vsel %vm628_vm1, %v673_v29, 0.0  ;;  %524 = vst.msk [vmem:[%s1095_s10 + $0x2c] sm:$0xf] %vm512_vm2, %v860_v38  ;;  %v858_v3 = vpack.c.bf16 %v420_v32, %v420_v32  ;;  %v676_v59 = vmul.f32 %v925_v24, %v619_v46  ;;  %v621_v1 = vsel %vm573_vm14, %v420_v32, 0.0 }
  0xeb   : > { %v691_v35 = vadd.f32 %v690_v27, %v689_v26  ;;  %v638_v37 = vadd.f32 %v637_v34, %v636_v9  ;;  %520 = vst.msk [vmem:[%s1095_s10 + $0x1c] sm:$0xf] %vm512_vm2, %v856_v30  ;;  %v1174_v39 = vpop.f32.mrf.mxu1  ;;  %v854_v43 = vpack.c.bf16 %v404_v31, %v404_v31  ;;  %v617_v48 = vsel %vm569_vm12, %v404_v31, 0.0 }
  0xec   : > { %v639_v52 = vsel %vm628_vm1, %v617_v48, 0.0  ;;  %v674_v53 = vmul.f32 %v617_v48, %v404_v31  ;;  %522 = vst.msk [vmem:[%s1095_s10 + $0x24] sm:$0xf] %vm512_vm2, %v858_v3  ;;  %v863_v61 = vpack.c.bf16 %v1174_v39, %v1174_v39  ;;  %v561_v5 = vadd.s32 %v1080_v28, %v543_v45 }
  0xed   : > { %v693_v40 = vadd.f32 %v692_v42, %v691_v35  ;;  %v433_v50 = vpop.f32.mrf.mxu1  ;;  %518 = vst.msk [vmem:[%s1095_s10 + $0x14] sm:$0xf] %vm512_vm2, %v854_v43  ;;  %v640_v57 = vadd.f32 %v639_v52, %v638_v37  ;;  %v696_v6 = vsel %vm628_vm1, %v675_v51, 0.0  ;;  %v677_v8 = vmul.f32 %v620_v47, %v1143_v16 }
  0xee   : > { %v694_v60 = vsel %vm628_vm1, %v674_v53, 0.0  ;;  %v861_v62 = vpack.c.bf16 %v433_v50, %v433_v50  ;;  %v643_v11 = vsel %vm628_vm1, %v619_v46, 0.0  ;;  %527 = vst.msk [vmem:[%s1095_s10 + $0x38] sm:$0xf] %vm512_vm2, %v863_v61  ;;  %v645_v17 = vsel %vm628_vm1, %v620_v47, 0.0 }
  0xef   : > { %v1195_v58 = vpop.f32.mrf.mxu1  ;;  %v642_v63 = vadd.f32 %v641_v54, %v640_v57  ;;  %v695_v0 = vadd.f32 %v694_v60, %v693_v40  ;;  %v698_v16 = vsel %vm628_vm1, %v676_v59, 0.0  ;;  %v678_v18 = vmul.f32 %v621_v1, %v420_v32 }
  0xf0   : > { %525 = vst.msk [vmem:[%s1095_s10 + $0x30] sm:$0xf] %vm512_vm2, %v861_v62  ;;  %v864_v12 = vpack.c.bf16 %v1195_v58, %v1195_v58  ;;  %v623_v20 = vsel %vm575_vm13, %v1155_v25, 0.0  ;;  %v679_v23 = vmul.f32 %v1128_v2, %v622_v13  ;;  %v700_v7 = vsel %vm628_vm1, %v677_v8, 0.0 }
  0xf1   : > { %v436_v4 = vpop.f32.mrf.mxu1  ;;  %v644_v14 = vadd.f32 %v643_v11, %v642_v63  ;;  %v697_v15 = vadd.f32 %v696_v6, %v695_v0  ;;  %v647_v24 = vsel %vm628_vm1, %v621_v1, 0.0  ;;  %vm577_vm0 = vcmp.lt.s32.totalorder %v561_v5, 288 }
  0xf2   : > { %528 = vst.msk [vmem:[%s1095_s10 + $0x3c] sm:$0xf] %vm512_vm2, %v864_v12  ;;  %v862_v19 = vpack.c.bf16 %v436_v4, %v436_v4  ;;  %v624_v27 = vsel %vm576_vm15, %v433_v50, 0.0  ;;  %v649_v10 = vsel %vm628_vm1, %v622_v13, 0.0  ;;  %v680_v29 = vmul.f32 %v1155_v25, %v623_v20 }
  0xf3   : > { %v699_v21 = vadd.f32 %v698_v16, %v697_v15  ;;  %v646_v22 = vadd.f32 %v645_v17, %v644_v14  ;;  %v702_v30 = vsel %vm628_vm1, %v678_v18, 0.0  ;;  %vm578_vm3 = vcmp.lt.s32.totalorder %v562_v49, 288 }
  0xf4   : > { %526 = vst.msk [vmem:[%s1095_s10 + $0x34] sm:$0xf] %vm512_vm2, %v862_v19  ;;  %v625_v31 = vsel %vm577_vm0, %v436_v4, 0.0  ;;  %v704_v32 = vsel %vm628_vm1, %v679_v23, 0.0  ;;  %v651_v33 = vsel %vm628_vm1, %v623_v20, 0.0  ;;  %v681_v34 = vmul.f32 %v624_v27, %v433_v50 }
  0xf5   : > { %v648_v26 = vadd.f32 %v647_v24, %v646_v22  ;;  %v701_v9 = vadd.f32 %v700_v7, %v699_v21  ;;  %vm579_vm2 = vcmp.lt.s32.totalorder %v563_v55, 288  ;;  %v626_v36 = vsel %vm578_vm3, %v1174_v39, 0.0 }
  0xf6   : > { %v706_v38 = vsel %vm628_vm1, %v680_v29, 0.0  ;;  %v653_v25 = vsel %vm628_vm1, %v624_v27, 0.0  ;;  %v682_v41 = vmul.f32 %v625_v31, %v436_v4  ;;  %v627_v44 = vsel %vm579_vm2, %v1195_v58, 0.0 }
  0xf7   : > { %v650_v28 = vadd.f32 %v649_v10, %v648_v26  ;;  %v703_v2 = vadd.f32 %v702_v30, %v701_v9  ;;  %v683_v45 = vmul.f32 %v1174_v39, %v626_v36  ;;  %v708_v40 = vsel %vm628_vm1, %v681_v34, 0.0 }
  0xf8   : > { %v655_v46 = vsel %vm628_vm1, %v625_v31, 0.0  ;;  %v657_v50 = vsel %vm628_vm1, %v626_v36, 0.0  ;;  %v684_v51 = vmul.f32 %v1195_v58, %v627_v44  ;;  %v710_v52 = vsel %vm628_vm1, %v682_v41, 0.0 }
  0xf9   : > { %v705_v35 = vadd.f32 %v704_v32, %v703_v2  ;;  %v652_v37 = vadd.f32 %v651_v33, %v650_v28  ;;  %v712_v54 = vsel %vm628_vm1, %v683_v45, 0.0  ;;  %v659_v47 = vsel %vm628_vm1, %v627_v44, 0.0 }
  0xfa   : > { %v714_v56 = vsel %vm628_vm1, %v684_v51, 0.0 }
  0xfb   : > { %v654_v42 = vadd.f32 %v653_v25, %v652_v37  ;;  %v707_v43 = vadd.f32 %v706_v38, %v705_v35 }
  0xfd   : > { %v709_v48 = vadd.f32 %v708_v40, %v707_v43  ;;  %v656_v49 = vadd.f32 %v655_v46, %v654_v42 }
  0xff   : > { %v658_v53 = vadd.f32 %v657_v50, %v656_v49  ;;  %v711_v3 = vadd.f32 %v710_v52, %v709_v48 }
 0x101   : > { %v660_v57 = vadd.f32 %v659_v47, %v658_v53  ;;  %v713_v39 = vadd.f32 %v712_v54, %v711_v3 }
 0x103   : > { %v661_v59 = vrot.slane %v660_v57, 4  ;;  %v715_v60 = vadd.f32 %v714_v56, %v713_v39 }
 0x105   : > { %v662_v61 = vadd.f32 %v661_v59, %v660_v57  ;;  %v716_v62 = vrot.slane %v715_v60, 4 }
 0x107   : > { %v663_v63 = vrot.slane %v662_v61, 2  ;;  %v717_v58 = vadd.f32 %v716_v62, %v715_v60 }
 0x109   : > { %v664_v0 = vadd.f32 %v663_v63, %v662_v61  ;;  %v718_v1 = vrot.slane %v717_v58, 2 }
 0x10b   : > { %v665_v4 = vrot.slane %v664_v0, 1  ;;  %v719_v5 = vadd.f32 %v718_v1, %v717_v58 }
 0x10d   : > { %v666_v6 = vadd.f32 %v665_v4, %v664_v0  ;;  %v720_v8 = vrot.slane %v719_v5, 1 }
 0x10f   : > { %668 = vst.msk [vmem:[%s1074_s6] sm:$0x1] %vm667_vm4, %v666_v6  ;;  %v721_v11 = vadd.f32 %v720_v8, %v719_v5 }
 0x111   : > { %722 = vst.msk [vmem:[%s1074_s6 + $0x1] sm:$0x1] %vm667_vm4, %v721_v11 }
 0x112 PF: > { %s15_s15 = sadd.s32 1, %s955_s15  }
 0x113   : > { %p12_p5 = scmp.ge.s32.totalorder %s15_s15, 5  }
 0x115   :  { %14 = sbr.rel (!%p12_p5) target bundleno = 1 (0x1), region = 74 }

// kernel: generator_forward.9
= control target key start
LH: loop header
LB: loop body
LE: loop exit
PB: predicated region body
PF: predicated region fallthrough
CT: control target
= control target key end

     0   :  { %s684_s15 = smov 0   ;;  %s795_s0 = inlined_call_operand.vmem [shape: bf16[384,64], index: 0, kind: input, shape index: {}]   ;;  %s796_s1 = inlined_call_operand.vmem [shape: f32[2,64], index: 1, kind: input, shape index: {}]   ;;  %s797_s2 = inlined_call_operand.vmem [shape: bf16[64,128], index: 2, kind: input, shape index: {}]   ;;  %s798_s3 = inlined_call_operand.vmem [shape: f32[1,128], index: 3, kind: input, shape index: {}]   ;;  %s799_s4 = inlined_call_operand.vmem [shape: f32[384,128], index: 4, kind: output, shape index: {}]  }
   0x1 LB: > { %s532_s16 = sadd.s32 4294967295, %s657_s15   ;;  %p536_p0 = scmp.ge.s32.totalorder %s657_s15, 1  ;;  %s657_s15 = sphi %s684_s15, %s14_s15  }
   0x2   : > { %p163_p1 = scmp.lt.s32.totalorder %s657_s15, 4 }
   0x4   : > { %p164_p2 = pnand %p536_p0, %p163_p1 }
   0x5   : > { %s537_s19 = sshll.u32 (!%p164_p2), %s532_s16, 4 }
   0x6   : > { %167 = sbr.rel (%p164_p2) target bundleno = 240 (0xf0), region = 36  ;;  %p190_p3 = scmp.lt.s32.totalorder (!%p164_p2), %s537_s19, 47 }
   0xb   : > { %v647_v0 = vld [vmem:[%s797_s2 + $0x18] sm:$0xff]   ;;  %v235_v1 = vlaneseq  ;;  %v648_v2 = vld [vmem:[%s797_s2 + $0x10] sm:$0xff]   ;;  %s801_s19 = smov (!%p190_p3, %s537_s19), 47  ;;  %v649_v4 = vld [vmem:[%s797_s2 + $0x8] sm:$0xff]   ;;  %vm338_vm0 = vcmask 523264  }
   0xc   : > { %607 = vmatprep.subr.bf16.mxu0 %v647_v0  ;;  %631 = vmatprep.subr.bf16.mxu1 %v647_v0  ;;  %v234_v5 = vld [vmem:[%s796_s1] sm:$0x3]  ;;  %s538_s26 = sshll.u32 %s801_s19, 2  ;;  %s540_s6 = sshll.u32 %s801_s19, 3 }
   0xd   : > { %v236_v3 = vshrl.u32 %v235_v1, 7  ;;  %608 = vmatpush3.bf16.msra.mxu0 %v647_v0  ;;  %635 = vmatpush3.bf16.msra.mxu1 %v647_v0  ;;  %s710_s29 = scalar_lea.vmem %s795_s0, %s538_s26  ;;  %v650_v13 = vld [vmem:[%s797_s2] sm:$0xff]   ;;  %s774_s11 = scalar_lea.vmem %s799_s4, %s540_s6 }
   0xe   : > { %609 = vmatprep.subr.bf16.mxu0 %v648_v2  ;;  %632 = vmatprep.subr.bf16.mxu1 %v648_v2  ;;  %v557_v9 = vld [vmem:[%s710_s29] sm:$0xff]   ;;  %v588_v12 = vld [vmem:[%s710_s29 + $0x8] sm:$0xff]   ;;  %v589_v19 = vld [vmem:[%s710_s29 + $0x10] sm:$0xff]  }
   0xf   : > { %v237_v6 = vsub.s32 0, %v236_v3  ;;  %v257_v7 = vsub.s32 1, %v236_v3  ;;  %v591_v11 = vld [vmem:[%s710_s29 + $0x20] sm:$0xff]   ;;  %v558_v14 = vunpack.c.l.bf16 %v557_v9  ;;  %v559_v15 = vunpack.c.h.bf16 %v557_v9  ;;  %v592_v18 = vld [vmem:[%s710_s29 + $0x28] sm:$0xff]   ;;  %v593_v44 = vld [vmem:[%s710_s29 + $0x30] sm:$0xff]  }
  0x10   : > { %v574_v16 = vunpack.c.l.bf16 %v591_v11  ;;  %v575_v17 = vunpack.c.h.bf16 %v591_v11  ;;  %v562_v20 = vunpack.c.l.bf16 %v588_v12  ;;  %v563_v21 = vunpack.c.h.bf16 %v588_v12  ;;  %v590_v49 = vld [vmem:[%s710_s29 + $0x18] sm:$0xff]  }
  0x11   : > { %v712_v8 = vrot.slane %v234_v5, %v237_v6  ;;  %610 = vmatpush3.bf16.msra.mxu0 %v648_v2  ;;  %636 = vmatpush3.bf16.msra.mxu1 %v648_v2  ;;  %v715_v10 = vrot.slane %v234_v5, %v257_v7  ;;  %v578_v22 = vunpack.c.l.bf16 %v592_v18  ;;  %v579_v23 = vunpack.c.h.bf16 %v592_v18  ;;  %v594_v54 = vld [vmem:[%s710_s29 + $0x38] sm:$0xff]  }
  0x12   : > { %611 = vmatprep.subr.bf16.mxu0 %v649_v4  ;;  %633 = vmatprep.subr.bf16.mxu1 %v649_v4  ;;  %v566_v31 = vunpack.c.l.bf16 %v589_v19  ;;  %v567_v35 = vunpack.c.h.bf16 %v589_v19  ;;  %v582_v58 = vunpack.c.l.bf16 %v593_v44  ;;  %v583_v61 = vunpack.c.h.bf16 %v593_v44 }
  0x13   : > { %v239_v24 = vmul.f32 %v558_v14, %v712_v8  ;;  %v240_v25 = vmul.f32 %v559_v15, %v712_v8  ;;  %v247_v26 = vmul.f32 %v574_v16, %v712_v8  ;;  %v248_v27 = vmul.f32 %v575_v17, %v712_v8 }
  0x14   : > { %v241_v28 = vmul.f32 %v562_v20, %v712_v8  ;;  %v242_v29 = vmul.f32 %v563_v21, %v712_v8  ;;  %v249_v30 = vmul.f32 %v578_v22, %v712_v8  ;;  %v250_v39 = vmul.f32 %v579_v23, %v712_v8 }
  0x15   : > { %612 = vmatpush3.bf16.msra.mxu0 %v649_v4  ;;  %637 = vmatpush3.bf16.msra.mxu1 %v649_v4  ;;  %v259_v32 = vadd.f32 %v715_v10, %v239_v24  ;;  %v260_v33 = vadd.f32 %v715_v10, %v240_v25  ;;  %v267_v34 = vadd.f32 %v715_v10, %v247_v26  ;;  %v570_v62 = vunpack.c.l.bf16 %v590_v49 }
  0x16   : > { %613 = vmatprep.subr.bf16.mxu0 %v650_v13  ;;  %634 = vmatprep.subr.bf16.mxu1 %v650_v13  ;;  %v268_v36 = vadd.f32 %v715_v10, %v248_v27  ;;  %v261_v37 = vadd.f32 %v715_v10, %v241_v28  ;;  %v262_v38 = vadd.f32 %v715_v10, %v242_v29  ;;  %v571_v1 = vunpack.c.h.bf16 %v590_v49 }
  0x17   : > { %v275_v40 = vmax.f32 %v259_v32, 0.0  ;;  %v276_v41 = vmax.f32 %v260_v33, 0.0  ;;  %v283_v42 = vmax.f32 %v267_v34, 0.0  ;;  %v269_v43 = vadd.f32 %v715_v10, %v249_v30 }
  0x18   : > { %v284_v45 = vmax.f32 %v268_v36, 0.0  ;;  %v277_v46 = vmax.f32 %v261_v37, 0.0  ;;  %v278_v47 = vmax.f32 %v262_v38, 0.0  ;;  %v270_v48 = vadd.f32 %v715_v10, %v250_v39 }
  0x19   : > { %614 = vmatpush3.bf16.msra.mxu0 %v650_v13  ;;  %638 = vmatpush3.bf16.msra.mxu1 %v650_v13  ;;  %v291_v50 = vpack.c.bf16 %v276_v41, %v275_v40  ;;  %v285_v51 = vmax.f32 %v269_v43, 0.0  ;;  %v243_v52 = vmul.f32 %v566_v31, %v712_v8  ;;  %v244_v53 = vmul.f32 %v567_v35, %v712_v8 }
  0x1a   : > { %v295_v55 = vpack.c.bf16 %v284_v45, %v283_v42  ;;  %v292_v56 = vpack.c.bf16 %v278_v47, %v277_v46  ;;  %v286_v57 = vmax.f32 %v270_v48, 0.0  ;;  %v251_v0 = vmul.f32 %v582_v58, %v712_v8 }
  0x1b   : > { %615 = vmatprep.mubr.msk.bf16.mxu0 %vm338_vm0, %v291_v50  ;;  %v263_v59 = vadd.f32 %v715_v10, %v243_v52  ;;  %v264_v60 = vadd.f32 %v715_v10, %v244_v53  ;;  %v586_v2 = vunpack.c.l.bf16 %v594_v54  ;;  %v252_v5 = vmul.f32 %v583_v61, %v712_v8 }
  0x1c   : > { %623 = vmatprep.mubr.msk.bf16.mxu1 %vm338_vm0, %v295_v55  ;;  %616 = vmatmul.mubr.msk.bf16.vlgmr.msra.gmra.mxu0 %vm338_vm0, %v292_v56  ;;  %v296_v63 = vpack.c.bf16 %v286_v57, %v285_v51  ;;  %v245_v6 = vmul.f32 %v570_v62, %v712_v8  ;;  %v271_v7 = vadd.f32 %v715_v10, %v251_v0  ;;  %v587_v11 = vunpack.c.h.bf16 %v594_v54 }
  0x1d   : > { %v279_v3 = vmax.f32 %v263_v59, 0.0  ;;  %v280_v4 = vmax.f32 %v264_v60, 0.0  ;;  %v246_v9 = vmul.f32 %v571_v1, %v712_v8  ;;  %v253_v12 = vmul.f32 %v586_v2, %v712_v8 }
  0x1e   : > { %624 = vmatmul.mubr.msk.bf16.vlgmr.msra.gmra.mxu1 %vm338_vm0, %v296_v63  ;;  %v272_v14 = vadd.f32 %v715_v10, %v252_v5  ;;  %v265_v15 = vadd.f32 %v715_v10, %v245_v6  ;;  %v287_v16 = vmax.f32 %v271_v7, 0.0  ;;  %v254_v18 = vmul.f32 %v587_v11, %v712_v8  ;;  %v541_v8 = vld [vmem:[%s798_s3] ss:$0 sm:$0xff] }
  0x1f   : > { %v293_v13 = vpack.c.bf16 %v280_v4, %v279_v3  ;;  %v266_v17 = vadd.f32 %v715_v10, %v246_v9  ;;  %v273_v19 = vadd.f32 %v715_v10, %v253_v12 }
  0x20   : > { %v288_v20 = vmax.f32 %v272_v14, 0.0  ;;  %v281_v21 = vmax.f32 %v265_v15, 0.0  ;;  %v274_v23 = vadd.f32 %v715_v10, %v254_v18 }
  0x21   : > { %619 = vmatprep.mubr.msk.bf16.mxu0 %vm338_vm0, %v293_v13  ;;  %v282_v22 = vmax.f32 %v266_v17, 0.0  ;;  %v289_v24 = vmax.f32 %v273_v19, 0.0 }
  0x22   : > { %v297_v25 = vpack.c.bf16 %v288_v20, %v287_v16  ;;  %v290_v27 = vmax.f32 %v274_v23, 0.0 }
  0x23   : > { %v294_v26 = vpack.c.bf16 %v282_v22, %v281_v21 }
  0x24   : > { %627 = vmatprep.mubr.msk.bf16.mxu1 %vm338_vm0, %v297_v25  ;;  %v298_v28 = vpack.c.bf16 %v290_v27, %v289_v24 }
  0x25   : > { %620 = vmatmul.mubr.msk.bf16.gmra.mxu0 %vm338_vm0, %v294_v26 }
  0x26   : > { %628 = vmatmul.mubr.msk.bf16.gmra.mxu1 %vm338_vm0, %v298_v28 }
  0xdc   : > { %v617_v10 = vpop.f32.mrf.mxu0 }
  0xdd   : > { %v406_v29 = vadd.f32 %v617_v10, %v541_v8 }
  0xde   : > { %v625_v30 = vpop.f32.mrf.mxu1  ;;  %v397_v31 = vpop.f32.mrf.mxu0 }
  0xdf   : > { %462 = vst [vmem:[%s774_s11 + $0x10] sm:$0xff] %v406_v29  ;;  %v438_v32 = vadd.f32 %v625_v30, %v541_v8  ;;  %v398_v33 = vadd.f32 %v541_v8, %v397_v31 }
  0xe0   : > { %v429_v34 = vpop.f32.mrf.mxu1  ;;  %v618_v35 = vpop.f32.mrf.mxu0 }
  0xe1   : > { %470 = vst [vmem:[%s774_s11 + $0x50] sm:$0xff] %v438_v32  ;;  %460 = vst [vmem:[%s774_s11] sm:$0xff] %v398_v33  ;;  %v430_v36 = vadd.f32 %v541_v8, %v429_v34  ;;  %v409_v37 = vadd.f32 %v618_v35, %v541_v8 }
  0xe2   : > { %v626_v38 = vpop.f32.mrf.mxu1  ;;  %v400_v39 = vpop.f32.mrf.mxu0 }
  0xe3   : > { %468 = vst [vmem:[%s774_s11 + $0x40] sm:$0xff] %v430_v36  ;;  %463 = vst [vmem:[%s774_s11 + $0x18] sm:$0xff] %v409_v37  ;;  %v441_v40 = vadd.f32 %v626_v38, %v541_v8  ;;  %v401_v41 = vadd.f32 %v541_v8, %v400_v39 }
  0xe4   : > { %v432_v42 = vpop.f32.mrf.mxu1 }
  0xe5   : > { %471 = vst [vmem:[%s774_s11 + $0x58] sm:$0xff] %v441_v40  ;;  %461 = vst [vmem:[%s774_s11 + $0x8] sm:$0xff] %v401_v41  ;;  %v433_v43 = vadd.f32 %v541_v8, %v432_v42  ;;  %v621_v44 = vpop.f32.mrf.mxu0 }
  0xe6   : > { %v422_v45 = vadd.f32 %v621_v44, %v541_v8  ;;  %v629_v46 = vpop.f32.mrf.mxu1 }
  0xe7   : > { %469 = vst [vmem:[%s774_s11 + $0x48] sm:$0xff] %v433_v43  ;;  %v413_v47 = vpop.f32.mrf.mxu0  ;;  %v454_v48 = vadd.f32 %v629_v46, %v541_v8 }
  0xe8   : > { %466 = vst [vmem:[%s774_s11 + $0x30] sm:$0xff] %v422_v45  ;;  %v414_v49 = vadd.f32 %v541_v8, %v413_v47  ;;  %v445_v50 = vpop.f32.mrf.mxu1 }
  0xe9   : > { %v622_v51 = vpop.f32.mrf.mxu0  ;;  %474 = vst [vmem:[%s774_s11 + $0x70] sm:$0xff] %v454_v48  ;;  %v446_v52 = vadd.f32 %v541_v8, %v445_v50 }
  0xea   : > { %464 = vst [vmem:[%s774_s11 + $0x20] sm:$0xff] %v414_v49  ;;  %v425_v53 = vadd.f32 %v622_v51, %v541_v8  ;;  %v630_v54 = vpop.f32.mrf.mxu1 }
  0xeb   : > { %v416_v55 = vpop.f32.mrf.mxu0  ;;  %472 = vst [vmem:[%s774_s11 + $0x60] sm:$0xff] %v446_v52  ;;  %v457_v56 = vadd.f32 %v630_v54, %v541_v8 }
  0xec   : > { %467 = vst [vmem:[%s774_s11 + $0x38] sm:$0xff] %v425_v53  ;;  %v417_v57 = vadd.f32 %v541_v8, %v416_v55  ;;  %v448_v58 = vpop.f32.mrf.mxu1 }
  0xed   : > { %475 = vst [vmem:[%s774_s11 + $0x78] sm:$0xff] %v457_v56  ;;  %v449_v59 = vadd.f32 %v541_v8, %v448_v58 }
  0xee   : > { %465 = vst [vmem:[%s774_s11 + $0x28] sm:$0xff] %v417_v57 }
  0xef   : > { %473 = vst [vmem:[%s774_s11 + $0x68] sm:$0xff] %v449_v59 }
  0xf0 PF: > { %s14_s15 = sadd.s32 1, %s657_s15  }
  0xf1   : > { %p11_p4 = scmp.ge.s32.totalorder %s14_s15, 5  }
  0xf3   :  { %13 = sbr.rel (!%p11_p4) target bundleno = 1 (0x1), region = 66 }

</bundles_post_ra>
